<compile_context>
chip_gen: v7x
topology: tpu7x:2x2x1
jax: 0.10.0
libtpu: 0.0.40
codegen_flags: <defaults>
</compile_context>

<pallas_src>
import jax
import jax.numpy as jnp
import numpy as np
from jax.experimental import pallas as pl
from jax.experimental.pallas import tpu as pltpu


# ------------------------------ Pallas kernel -------------------------------

def _mfcc_cnn_kernel(xf_ref, w1_ref, b1_ref, sel1_ref, w2_ref, b2_ref,
                     sel2_ref, wf1_ref, bf1_ref, wf2_ref, bf2_ref,
                     out_ref,
                     unf1_ref, h1p_ref, unf2_ref, h2_ref, flat_ref):
    """Entire MFCCCNN forward, fully VMEM resident.

    xf   : (B*Lp1, C_in)    zero-padded, channels-last, batch-flattened input
    w1   : (K*C_in, 32)     conv1 weight, tap-major flattened   b1 : (1, 32)
    sel1 : (2*B*Lp2, D1)    bf16 0/1 selectors (even rows stacked over odd)
                            implementing stride-3 + maxpool(2) + conv2 pad
    w2   : (K*32, 64)       conv2 weight, tap-major flattened   b2 : (1, 64)
    sel2 : (2*P2*B, D2)     bf16 selectors for conv2 stride + pool2,
                            rows ordered (pool position, batch)
    wf1  : (P2*64, 128)     fc1 weight with PyTorch channel-major flatten
                            folded in                           bf1: (1, 128)
    wf2  : (128, 2)                                             bf2: (1, 2)
    scratch: unf1 (D1, K*C_in), h1p (B*Lp2, 32), unf2 (D2, K*32),
             h2 (P2*B, 64), flat (B, P2*64)
    """
    f32 = jnp.float32
    C_in = xf_ref.shape[1]
    K = w1_ref.shape[0] // C_in
    D1 = xf_ref.shape[0] - (K - 1)          # stride-1 conv1 positions
    C1 = w1_ref.shape[1]
    half1 = sel1_ref.shape[0] // 2          # B * Lp2
    D2 = half1 - (K - 1)                    # stride-1 conv2 positions
    C2 = w2_ref.shape[1]
    half2 = sel2_ref.shape[0] // 2          # P2 * B
    B = out_ref.shape[0]
    P2 = half2 // B

    # ---- conv1: unfold the K stride-1 taps into one (D1, K*C_in) slab and do
    # a single 40-deep matmul (instead of 5 MXU passes with 8-deep contraction)
    for k in range(K):
        unf1_ref[:, k * C_in:(k + 1) * C_in] = xf_ref[pl.ds(k, D1), :]
    h = jnp.maximum(
        jnp.dot(unf1_ref[...], w1_ref[...], preferred_element_type=f32)
        + b1_ref[...], 0.0)                                   # (D1, C1)

    # ---- conv1 stride-3 + maxpool(2) + conv2 zero-pad: ONE stacked selection
    # matmul (h streamed through the MXU once), elementwise max of the halves.
    hp = jnp.dot(sel1_ref[...].astype(f32), h, preferred_element_type=f32)
    h1p_ref[...] = jnp.maximum(hp[:half1, :], hp[half1:, :])  # (B*Lp2, C1)

    # ---- conv2: same tap folding -> single (D2, 160) @ (160, 64) matmul.
    for k in range(K):
        unf2_ref[:, k * C1:(k + 1) * C1] = h1p_ref[pl.ds(k, D2), :]
    g = jnp.maximum(
        jnp.dot(unf2_ref[...], w2_ref[...], preferred_element_type=f32)
        + b2_ref[...], 0.0)                                   # (D2, C2)

    # ---- conv2 stride-3 + maxpool(2): stacked selection + max.  Rows of h2
    # are (pool position, batch) ordered so the flatten below is contiguous.
    gp = jnp.dot(sel2_ref[...].astype(f32), g, preferred_element_type=f32)
    h2_ref[...] = jnp.maximum(gp[:half2, :], gp[half2:, :])   # (P2*B, C2)

    # ---- flatten + fc1 fused: place each pooled position's (B, C2) block
    # into contiguous lanes -> (B, P2*C2), one 256-deep fc1 matmul.
    # (The PyTorch channel-major flatten order is folded into wf1.)
    for l in range(P2):
        flat_ref[:, l * C2:(l + 1) * C2] = h2_ref[pl.ds(l * B, B), :]
    y = jnp.maximum(
        jnp.dot(flat_ref[...], wf1_ref[...], preferred_element_type=f32)
        + bf1_ref[...], 0.0)                                  # (B, 128)

    # ---- fc2
    out_ref[...] = (jnp.dot(y, wf2_ref[...], preferred_element_type=f32)
                    + bf2_ref[...]).astype(out_ref.dtype)


# --------------------- constant selection-matrix builders -------------------

def _stage1_selectors(B, Lp1, P1, Lp2, K, stride, pool):
    """Stacked even/odd 0/1 selector (2*B*Lp2, B*Lp1-K+1): stride-3 subsample
    + maxpool(2) even/odd picks + zero rows for conv2's padding."""
    D1 = B * Lp1 - (K - 1)
    sel = np.zeros((2, B * Lp2, D1), np.float32)
    pad2 = (Lp2 - P1) // 2
    for b in range(B):
        for j in range(P1):
            sel[0, b * Lp2 + pad2 + j, b * Lp1 + stride * (pool * j)] = 1.0
            sel[1, b * Lp2 + pad2 + j, b * Lp1 + stride * (pool * j + 1)] = 1.0
    return sel.reshape(2 * B * Lp2, D1)


def _stage2_selectors(B, Lp2, P2, K, stride, pool):
    """Stacked even/odd 0/1 selector (2*P2*B, B*Lp2-K+1) for conv2's stride-3
    subsample + maxpool(2).  Rows ordered (pool position, batch)."""
    D2 = B * Lp2 - (K - 1)
    sel = np.zeros((2, P2 * B, D2), np.float32)
    for l in range(P2):
        for b in range(B):
            sel[0, l * B + b, b * Lp2 + stride * (pool * l)] = 1.0
            sel[1, l * B + b, b * Lp2 + stride * (pool * l + 1)] = 1.0
    return sel.reshape(2 * P2 * B, D2)


# ------------------------------- Forward pass --------------------------------

def mfcc_cnn_forward(x, kp):
    """x: (B, nmfcc, T), same NCW layout as the PyTorch module."""
    B, C_in, T = x.shape
    K, stride, pad, pool = 5, 3, 2, 2
    C1 = kp["w1"].shape[1]
    C2 = kp["w2"].shape[1]
    N1 = kp["wf1"].shape[1]
    N2 = kp["wf2"].shape[1]

    Lp1 = T + 2 * pad
    L1 = (Lp1 - K) // stride + 1
    P1 = L1 // pool
    Lp2 = P1 + 2 * pad
    L2 = (Lp2 - K) // stride + 1
    P2 = L2 // pool
    assert kp["wf1"].shape[0] == P2 * C2, "input_dim inconsistent with T"

    D1 = B * Lp1 - (K - 1)
    D2 = B * Lp2 - (K - 1)

    # Only non-kernel HLOs: channels-last, zero-pad time, flatten batch rows.
    xf = jnp.pad(jnp.transpose(x, (0, 2, 1)), ((0, 0), (pad, pad), (0, 0)))
    xf = xf.reshape(B * Lp1, C_in)

    # Constant bf16 selectors (exact for 0/1, half the DMA bytes of f32).
    sel1 = jnp.asarray(_stage1_selectors(B, Lp1, P1, Lp2, K, stride, pool),
                       jnp.bfloat16)
    sel2 = jnp.asarray(_stage2_selectors(B, Lp2, P2, K, stride, pool),
                       jnp.bfloat16)

    operands = (xf, kp["w1"], kp["b1"], sel1, kp["w2"], kp["b2"], sel2,
                kp["wf1"], kp["bf1"], kp["wf2"], kp["bf2"])

    flops = (2 * D1 * (K * C_in) * C1 + 2 * (2 * B * Lp2) * D1 * C1
             + 2 * D2 * (K * C1) * C2 + 2 * (2 * B * P2) * D2 * C2
             + 2 * B * (P2 * C2) * N1 + 2 * B * N1 * N2)
    bytes_accessed = int(sum(int(o.size) * o.dtype.itemsize for o in operands)
                         + B * N2 * 4)

    return pl.pallas_call(
        _mfcc_cnn_kernel,
        out_shape=jax.ShapeDtypeStruct((B, N2), x.dtype),
        in_specs=[pl.BlockSpec(memory_space=pltpu.MemorySpace.VMEM)]
                 * len(operands),
        out_specs=pl.BlockSpec(memory_space=pltpu.MemorySpace.VMEM),
        scratch_shapes=[
            pltpu.VMEM((D1, K * C_in), jnp.float32),    # conv1 tap unfold
            pltpu.VMEM((B * Lp2, C1), jnp.float32),     # padded pool1 output
            pltpu.VMEM((D2, K * C1), jnp.float32),      # conv2 tap unfold
            pltpu.VMEM((P2 * B, C2), jnp.float32),      # pool2 output
            pltpu.VMEM((B, P2 * C2), jnp.float32),      # flattened fc1 input
        ],
        cost_estimate=pl.CostEstimate(flops=flops, transcendentals=0,
                                      bytes_accessed=bytes_accessed),
    )(*operands)


# ------------------------------ Parameters -----------------------------------

def init_params(key, nmfcc, input_dim):
    """PyTorch-layout parameters (nn.Conv1d / nn.Linear default-style init)."""
    keys = jax.random.split(key, 8)

    def u(k, shape, fan_in):
        bound = 1.0 / np.sqrt(fan_in)
        return jax.random.uniform(k, shape, jnp.float32, -bound, bound)

    return {
        "conv1_w": u(keys[0], (32, nmfcc, 5), nmfcc * 5),
        "conv1_b": u(keys[1], (32,), nmfcc * 5),
        "conv2_w": u(keys[2], (64, 32, 5), 32 * 5),
        "conv2_b": u(keys[3], (64,), 32 * 5),
        "fc1_w":   u(keys[4], (128, input_dim), input_dim),
        "fc1_b":   u(keys[5], (128,), input_dim),
        "fc2_w":   u(keys[6], (2, 128), 128),
        "fc2_b":   u(keys[7], (2,), 128),
    }


def pack_params(p):
    """One-time conversion of PyTorch-layout weights to the kernel layouts."""
    c1o, c_in, k1 = p["conv1_w"].shape                 # (32, nmfcc, 5)
    c2o, c2i, k2 = p["conv2_w"].shape                  # (64, 32, 5)
    n1, input_dim = p["fc1_w"].shape
    p2 = input_dim // c2o                              # pooled conv2 length
    assert p2 * c2o == input_dim
    return {
        # tap-major flattened conv weights: w[k*C_in + c, o] = conv_w[o, c, k]
        "w1":  jnp.transpose(p["conv1_w"], (2, 1, 0)).reshape(k1 * c_in, c1o),
        "b1":  p["conv1_b"].reshape(1, -1),
        "w2":  jnp.transpose(p["conv2_w"], (2, 1, 0)).reshape(k2 * c2i, c2o),
        "b2":  p["conv2_b"].reshape(1, -1),
        # fc1 consumes the kernel's (l-major, c-minor) flatten; PyTorch's
        # flatten is channel-major: wf1[l*C2 + c, n] = fc1_w[n, c*P2 + l]
        "wf1": jnp.transpose(p["fc1_w"].reshape(n1, c2o, p2),
                             (2, 1, 0)).reshape(p2 * c2o, n1),
        "bf1": p["fc1_b"].reshape(1, -1),
        "wf2": p["fc2_w"].T,                            # (128, 2)
        "bf2": p["fc2_b"].reshape(1, -1),
    }


# --------------------------- plain-JAX reference -----------------------------

def _reference_forward(x, p):
    def conv1d(x, w, b, stride, padding):
        y = jax.lax.conv_general_dilated(
            x, w, window_strides=(stride,), padding=[(padding, padding)],
            dimension_numbers=("NCH", "OIH", "NCH"))
        return y + b[None, :, None]

    def maxpool2(x):
        B, C, L = x.shape
        return jnp.max(x[:, :, :(L // 2) * 2].reshape(B, C, L // 2, 2), axis=-1)

    h = maxpool2(jax.nn.relu(conv1d(x, p["conv1_w"], p["conv1_b"], 3, 2)))
    h = maxpool2(jax.nn.relu(conv1d(h, p["conv2_w"], p["conv2_b"], 3, 2)))
    h = h.reshape(h.shape[0], -1)
    h = jax.nn.relu(h @ p["fc1_w"].T + p["fc1_b"])
    return h @ p["fc2_w"].T + p["fc2_b"]


if __name__ == "__main__":
    # T=144: conv1(k=5,s=3,p=2) -> 48 -> pool -> 24 -> conv2 -> 8 -> pool -> 4
    # channel-major flatten: 64 * 4 = 256 = input_dim
    B, nmfcc, T = 2, 8, 144
    input_dim = 256

    key = jax.random.PRNGKey(0)
    kx, kparam = jax.random.split(key)
    x = jax.random.normal(kx, (B, nmfcc, T), jnp.float32)
    torch_params = init_params(kparam, nmfcc, input_dim)
    kernel_params = pack_params(torch_params)

    out = jax.jit(mfcc_cnn_forward)(x, kernel_params)
    jax.block_until_ready(out)
    assert out.shape == (B, 2) and out.dtype == jnp.float32

    ref = _reference_forward(x, torch_params)
    assert jnp.allclose(out, ref, atol=2e-2, rtol=2e-2), float(
        jnp.max(jnp.abs(out - ref)))

    print("KERNEL_OK")
</pallas_src>

<mosaic_0001>
module attributes {stable_mosaic.version = 11 : i64} {
  func.func @_mfcc_cnn_kernel(%arg0: memref<296x8xf32, #tpu.memory_space<vmem>>, %arg1: memref<40x32xf32, #tpu.memory_space<vmem>>, %arg2: memref<1x32xf32, #tpu.memory_space<vmem>>, %arg3: memref<112x292xbf16, #tpu.memory_space<vmem>>, %arg4: memref<160x64xf32, #tpu.memory_space<vmem>>, %arg5: memref<1x64xf32, #tpu.memory_space<vmem>>, %arg6: memref<16x52xbf16, #tpu.memory_space<vmem>>, %arg7: memref<256x128xf32, #tpu.memory_space<vmem>>, %arg8: memref<1x128xf32, #tpu.memory_space<vmem>>, %arg9: memref<128x2xf32, #tpu.memory_space<vmem>>, %arg10: memref<1x2xf32, #tpu.memory_space<vmem>>, %arg11: memref<2x2xf32, #tpu.memory_space<vmem>>, %arg12: memref<292x40xf32, #tpu.memory_space<vmem>>, %arg13: memref<56x32xf32, #tpu.memory_space<vmem>>, %arg14: memref<52x160xf32, #tpu.memory_space<vmem>>, %arg15: memref<8x64xf32, #tpu.memory_space<vmem>>, %arg16: memref<2x256xf32, #tpu.memory_space<vmem>>) attributes {dimension_semantics = [], scalar_prefetch = 0 : i64, scratch_operands = 5 : i64, tpu.core_type = #tpu.core_type<tc>} {
    %c0 = arith.constant 0 : index
    %c0_0 = arith.constant 0 : index
    %0 = vector.load %arg0[%c0, %c0_0] : memref<296x8xf32, #tpu.memory_space<vmem>>, vector<292x8xf32>
    %c0_1 = arith.constant 0 : index
    %c0_2 = arith.constant 0 : index
    %1 = vector.load %arg12[%c0_1, %c0_2] : memref<292x40xf32, #tpu.memory_space<vmem>>, vector<292x8xf32>
    tpu.vector_store %arg12[%c0_1, %c0_2], %0 {strides = array<i32>} : memref<292x40xf32, #tpu.memory_space<vmem>>, vector<292x8xf32>,
    %c1 = arith.constant 1 : index
    %c0_3 = arith.constant 0 : index
    %2 = vector.load %arg0[%c1, %c0_3] : memref<296x8xf32, #tpu.memory_space<vmem>>, vector<292x8xf32>
    %c0_4 = arith.constant 0 : index
    %c8 = arith.constant 8 : index
    %3 = vector.load %arg12[%c0_4, %c8] : memref<292x40xf32, #tpu.memory_space<vmem>>, vector<292x8xf32>
    tpu.vector_store %arg12[%c0_4, %c8], %2 {strides = array<i32>} : memref<292x40xf32, #tpu.memory_space<vmem>>, vector<292x8xf32>,
    %c2 = arith.constant 2 : index
    %c0_5 = arith.constant 0 : index
    %4 = vector.load %arg0[%c2, %c0_5] : memref<296x8xf32, #tpu.memory_space<vmem>>, vector<292x8xf32>
    %c0_6 = arith.constant 0 : index
    %c16 = arith.constant 16 : index
    %5 = vector.load %arg12[%c0_6, %c16] : memref<292x40xf32, #tpu.memory_space<vmem>>, vector<292x8xf32>
    tpu.vector_store %arg12[%c0_6, %c16], %4 {strides = array<i32>} : memref<292x40xf32, #tpu.memory_space<vmem>>, vector<292x8xf32>,
    %c3 = arith.constant 3 : index
    %c0_7 = arith.constant 0 : index
    %6 = vector.load %arg0[%c3, %c0_7] : memref<296x8xf32, #tpu.memory_space<vmem>>, vector<292x8xf32>
    %c0_8 = arith.constant 0 : index
    %c24 = arith.constant 24 : index
    %7 = vector.load %arg12[%c0_8, %c24] : memref<292x40xf32, #tpu.memory_space<vmem>>, vector<292x8xf32>
    tpu.vector_store %arg12[%c0_8, %c24], %6 {strides = array<i32>} : memref<292x40xf32, #tpu.memory_space<vmem>>, vector<292x8xf32>,
    %c4 = arith.constant 4 : index
    %c0_9 = arith.constant 0 : index
    %8 = vector.load %arg0[%c4, %c0_9] : memref<296x8xf32, #tpu.memory_space<vmem>>, vector<292x8xf32>
    %c0_10 = arith.constant 0 : index
    %c32 = arith.constant 32 : index
    %9 = vector.load %arg12[%c0_10, %c32] : memref<292x40xf32, #tpu.memory_space<vmem>>, vector<292x8xf32>
    tpu.vector_store %arg12[%c0_10, %c32], %8 {strides = array<i32>} : memref<292x40xf32, #tpu.memory_space<vmem>>, vector<292x8xf32>,
    %c0_11 = arith.constant 0 : index
    %c0_12 = arith.constant 0 : index
    %10 = vector.load %arg12[%c0_11, %c0_12] : memref<292x40xf32, #tpu.memory_space<vmem>>, vector<292x40xf32>
    %c0_13 = arith.constant 0 : index
    %c0_14 = arith.constant 0 : index
    %11 = vector.load %arg1[%c0_13, %c0_14] : memref<40x32xf32, #tpu.memory_space<vmem>>, vector<40x32xf32>
    %cst = arith.constant dense<0.000000e+00> : vector<292x32xf32>
    %12 = tpu.matmul %10, %11, %cst {dimension_numbers = #tpu.dot_dimension_numbers<[1], [0], [0], [1], [0, 0, 1, 1], [], []>} : vector<292x40xf32>, vector<40x32xf32>, vector<292x32xf32> -> vector<292x32xf32>
    %c0_15 = arith.constant 0 : index
    %c0_16 = arith.constant 0 : index
    %13 = vector.load %arg2[%c0_15, %c0_16] : memref<1x32xf32, #tpu.memory_space<vmem>>, vector<1x32xf32>
    %14 = vector.broadcast %13 : vector<1x32xf32> to vector<292x32xf32>
    %15 = arith.addf %12, %14 : vector<292x32xf32>
    %cst_17 = arith.constant 0.000000e+00 : f32
    %16 = vector.broadcast %cst_17 : f32 to vector<292x32xf32>
    %17 = arith.maximumf %15, %16 : vector<292x32xf32>
    %c0_18 = arith.constant 0 : index
    %c0_19 = arith.constant 0 : index
    %18 = vector.load %arg3[%c0_18, %c0_19] : memref<112x292xbf16, #tpu.memory_space<vmem>>, vector<112x292xbf16>
    %19 = arith.extf %18 : vector<112x292xbf16> to vector<112x292xf32>
    %cst_20 = arith.constant dense<0.000000e+00> : vector<112x32xf32>
    %20 = tpu.matmul %19, %17, %cst_20 {dimension_numbers = #tpu.dot_dimension_numbers<[1], [0], [0], [1], [0, 0, 1, 1], [], []>} : vector<112x292xf32>, vector<292x32xf32>, vector<112x32xf32> -> vector<112x32xf32>
    %21 = vector.extract_strided_slice %20 {offsets = [0, 0], sizes = [56, 32], strides = [1, 1]} : vector<112x32xf32> to vector<56x32xf32>
    %22 = vector.extract_strided_slice %20 {offsets = [56, 0], sizes = [56, 32], strides = [1, 1]} : vector<112x32xf32> to vector<56x32xf32>
    %23 = arith.maximumf %21, %22 : vector<56x32xf32>
    %c0_21 = arith.constant 0 : index
    %c0_22 = arith.constant 0 : index
    %24 = vector.load %arg13[%c0_21, %c0_22] : memref<56x32xf32, #tpu.memory_space<vmem>>, vector<56x32xf32>
    tpu.vector_store %arg13[%c0_21, %c0_22], %23 {strides = array<i32>} : memref<56x32xf32, #tpu.memory_space<vmem>>, vector<56x32xf32>,
    %c0_23 = arith.constant 0 : index
    %c0_24 = arith.constant 0 : index
    %25 = vector.load %arg13[%c0_23, %c0_24] : memref<56x32xf32, #tpu.memory_space<vmem>>, vector<52x32xf32>
    %c0_25 = arith.constant 0 : index
    %c0_26 = arith.constant 0 : index
    %26 = vector.load %arg14[%c0_25, %c0_26] : memref<52x160xf32, #tpu.memory_space<vmem>>, vector<52x32xf32>
    tpu.vector_store %arg14[%c0_25, %c0_26], %25 {strides = array<i32>} : memref<52x160xf32, #tpu.memory_space<vmem>>, vector<52x32xf32>,
    %c1_27 = arith.constant 1 : index
    %c0_28 = arith.constant 0 : index
    %27 = vector.load %arg13[%c1_27, %c0_28] : memref<56x32xf32, #tpu.memory_space<vmem>>, vector<52x32xf32>
    %c0_29 = arith.constant 0 : index
    %c32_30 = arith.constant 32 : index
    %28 = vector.load %arg14[%c0_29, %c32_30] : memref<52x160xf32, #tpu.memory_space<vmem>>, vector<52x32xf32>
    tpu.vector_store %arg14[%c0_29, %c32_30], %27 {strides = array<i32>} : memref<52x160xf32, #tpu.memory_space<vmem>>, vector<52x32xf32>,
    %c2_31 = arith.constant 2 : index
    %c0_32 = arith.constant 0 : index
    %29 = vector.load %arg13[%c2_31, %c0_32] : memref<56x32xf32, #tpu.memory_space<vmem>>, vector<52x32xf32>
    %c0_33 = arith.constant 0 : index
    %c64 = arith.constant 64 : index
    %30 = vector.load %arg14[%c0_33, %c64] : memref<52x160xf32, #tpu.memory_space<vmem>>, vector<52x32xf32>
    tpu.vector_store %arg14[%c0_33, %c64], %29 {strides = array<i32>} : memref<52x160xf32, #tpu.memory_space<vmem>>, vector<52x32xf32>,
    %c3_34 = arith.constant 3 : index
    %c0_35 = arith.constant 0 : index
    %31 = vector.load %arg13[%c3_34, %c0_35] : memref<56x32xf32, #tpu.memory_space<vmem>>, vector<52x32xf32>
    %c0_36 = arith.constant 0 : index
    %c96 = arith.constant 96 : index
    %32 = vector.load %arg14[%c0_36, %c96] : memref<52x160xf32, #tpu.memory_space<vmem>>, vector<52x32xf32>
    tpu.vector_store %arg14[%c0_36, %c96], %31 {strides = array<i32>} : memref<52x160xf32, #tpu.memory_space<vmem>>, vector<52x32xf32>,
    %c4_37 = arith.constant 4 : index
    %c0_38 = arith.constant 0 : index
    %33 = vector.load %arg13[%c4_37, %c0_38] : memref<56x32xf32, #tpu.memory_space<vmem>>, vector<52x32xf32>
    %c0_39 = arith.constant 0 : index
    %c128 = arith.constant 128 : index
    %34 = vector.load %arg14[%c0_39, %c128] : memref<52x160xf32, #tpu.memory_space<vmem>>, vector<52x32xf32>
    tpu.vector_store %arg14[%c0_39, %c128], %33 {strides = array<i32>} : memref<52x160xf32, #tpu.memory_space<vmem>>, vector<52x32xf32>,
    %c0_40 = arith.constant 0 : index
    %c0_41 = arith.constant 0 : index
    %35 = vector.load %arg14[%c0_40, %c0_41] : memref<52x160xf32, #tpu.memory_space<vmem>>, vector<52x160xf32>
    %c0_42 = arith.constant 0 : index
    %c0_43 = arith.constant 0 : index
    %36 = vector.load %arg4[%c0_42, %c0_43] : memref<160x64xf32, #tpu.memory_space<vmem>>, vector<160x64xf32>
    %cst_44 = arith.constant dense<0.000000e+00> : vector<52x64xf32>
    %37 = tpu.matmul %35, %36, %cst_44 {dimension_numbers = #tpu.dot_dimension_numbers<[1], [0], [0], [1], [0, 0, 1, 1], [], []>} : vector<52x160xf32>, vector<160x64xf32>, vector<52x64xf32> -> vector<52x64xf32>
    %c0_45 = arith.constant 0 : index
    %c0_46 = arith.constant 0 : index
    %38 = vector.load %arg5[%c0_45, %c0_46] : memref<1x64xf32, #tpu.memory_space<vmem>>, vector<1x64xf32>
    %39 = vector.broadcast %38 : vector<1x64xf32> to vector<52x64xf32>
    %40 = arith.addf %37, %39 : vector<52x64xf32>
    %cst_47 = arith.constant 0.000000e+00 : f32
    %41 = vector.broadcast %cst_47 : f32 to vector<52x64xf32>
    %42 = arith.maximumf %40, %41 : vector<52x64xf32>
    %c0_48 = arith.constant 0 : index
    %c0_49 = arith.constant 0 : index
    %43 = vector.load %arg6[%c0_48, %c0_49] : memref<16x52xbf16, #tpu.memory_space<vmem>>, vector<16x52xbf16>
    %44 = arith.extf %43 : vector<16x52xbf16> to vector<16x52xf32>
    %cst_50 = arith.constant dense<0.000000e+00> : vector<16x64xf32>
    %45 = tpu.matmul %44, %42, %cst_50 {dimension_numbers = #tpu.dot_dimension_numbers<[1], [0], [0], [1], [0, 0, 1, 1], [], []>} : vector<16x52xf32>, vector<52x64xf32>, vector<16x64xf32> -> vector<16x64xf32>
    %46 = vector.extract_strided_slice %45 {offsets = [0, 0], sizes = [8, 64], strides = [1, 1]} : vector<16x64xf32> to vector<8x64xf32>
    %47 = vector.extract_strided_slice %45 {offsets = [8, 0], sizes = [8, 64], strides = [1, 1]} : vector<16x64xf32> to vector<8x64xf32>
    %48 = arith.maximumf %46, %47 : vector<8x64xf32>
    %c0_51 = arith.constant 0 : index
    %c0_52 = arith.constant 0 : index
    %49 = vector.load %arg15[%c0_51, %c0_52] : memref<8x64xf32, #tpu.memory_space<vmem>>, vector<8x64xf32>
    tpu.vector_store %arg15[%c0_51, %c0_52], %48 {strides = array<i32>} : memref<8x64xf32, #tpu.memory_space<vmem>>, vector<8x64xf32>,
    %c0_53 = arith.constant 0 : index
    %c0_54 = arith.constant 0 : index
    %50 = vector.load %arg15[%c0_53, %c0_54] : memref<8x64xf32, #tpu.memory_space<vmem>>, vector<2x64xf32>
    %c0_55 = arith.constant 0 : index
    %c0_56 = arith.constant 0 : index
    %51 = vector.load %arg16[%c0_55, %c0_56] : memref<2x256xf32, #tpu.memory_space<vmem>>, vector<2x64xf32>
    tpu.vector_store %arg16[%c0_55, %c0_56], %50 {strides = array<i32>} : memref<2x256xf32, #tpu.memory_space<vmem>>, vector<2x64xf32>,
    %c2_57 = arith.constant 2 : index
    %c0_58 = arith.constant 0 : index
    %52 = vector.load %arg15[%c2_57, %c0_58] : memref<8x64xf32, #tpu.memory_space<vmem>>, vector<2x64xf32>
    %c0_59 = arith.constant 0 : index
    %c64_60 = arith.constant 64 : index
    %53 = vector.load %arg16[%c0_59, %c64_60] : memref<2x256xf32, #tpu.memory_space<vmem>>, vector<2x64xf32>
    tpu.vector_store %arg16[%c0_59, %c64_60], %52 {strides = array<i32>} : memref<2x256xf32, #tpu.memory_space<vmem>>, vector<2x64xf32>,
    %c4_61 = arith.constant 4 : index
    %c0_62 = arith.constant 0 : index
    %54 = vector.load %arg15[%c4_61, %c0_62] : memref<8x64xf32, #tpu.memory_space<vmem>>, vector<2x64xf32>
    %c0_63 = arith.constant 0 : index
    %c128_64 = arith.constant 128 : index
    %55 = vector.load %arg16[%c0_63, %c128_64] : memref<2x256xf32, #tpu.memory_space<vmem>>, vector<2x64xf32>
    tpu.vector_store %arg16[%c0_63, %c128_64], %54 {strides = array<i32>} : memref<2x256xf32, #tpu.memory_space<vmem>>, vector<2x64xf32>,
    %c6 = arith.constant 6 : index
    %c0_65 = arith.constant 0 : index
    %56 = vector.load %arg15[%c6, %c0_65] : memref<8x64xf32, #tpu.memory_space<vmem>>, vector<2x64xf32>
    %c0_66 = arith.constant 0 : index
    %c192 = arith.constant 192 : index
    %57 = vector.load %arg16[%c0_66, %c192] : memref<2x256xf32, #tpu.memory_space<vmem>>, vector<2x64xf32>
    tpu.vector_store %arg16[%c0_66, %c192], %56 {strides = array<i32>} : memref<2x256xf32, #tpu.memory_space<vmem>>, vector<2x64xf32>,
    %c0_67 = arith.constant 0 : index
    %c0_68 = arith.constant 0 : index
    %58 = vector.load %arg16[%c0_67, %c0_68] : memref<2x256xf32, #tpu.memory_space<vmem>>, vector<2x256xf32>
    %c0_69 = arith.constant 0 : index
    %c0_70 = arith.constant 0 : index
    %59 = vector.load %arg7[%c0_69, %c0_70] : memref<256x128xf32, #tpu.memory_space<vmem>>, vector<256x128xf32>
    %cst_71 = arith.constant dense<0.000000e+00> : vector<2x128xf32>
    %60 = tpu.matmul %58, %59, %cst_71 {dimension_numbers = #tpu.dot_dimension_numbers<[1], [0], [0], [1], [0, 0, 1, 1], [], []>} : vector<2x256xf32>, vector<256x128xf32>, vector<2x128xf32> -> vector<2x128xf32>
    %c0_72 = arith.constant 0 : index
    %c0_73 = arith.constant 0 : index
    %61 = vector.load %arg8[%c0_72, %c0_73] : memref<1x128xf32, #tpu.memory_space<vmem>>, vector<1x128xf32>
    %62 = vector.broadcast %61 : vector<1x128xf32> to vector<2x128xf32>
    %63 = arith.addf %60, %62 : vector<2x128xf32>
    %cst_74 = arith.constant 0.000000e+00 : f32
    %64 = vector.broadcast %cst_74 : f32 to vector<2x128xf32>
    %65 = arith.maximumf %63, %64 : vector<2x128xf32>
    %c0_75 = arith.constant 0 : index
    %c0_76 = arith.constant 0 : index
    %66 = vector.load %arg9[%c0_75, %c0_76] : memref<128x2xf32, #tpu.memory_space<vmem>>, vector<128x2xf32>
    %cst_77 = arith.constant dense<0.000000e+00> : vector<2x2xf32>
    %67 = tpu.matmul %65, %66, %cst_77 {dimension_numbers = #tpu.dot_dimension_numbers<[1], [0], [0], [1], [0, 0, 1, 1], [], []>} : vector<2x128xf32>, vector<128x2xf32>, vector<2x2xf32> -> vector<2x2xf32>
    %c0_78 = arith.constant 0 : index
    %c0_79 = arith.constant 0 : index
    %68 = vector.load %arg10[%c0_78, %c0_79] : memref<1x2xf32, #tpu.memory_space<vmem>>, vector<1x2xf32>
    %69 = vector.broadcast %68 : vector<1x2xf32> to vector<2x2xf32>
    %70 = arith.addf %67, %69 : vector<2x2xf32>
    %c0_80 = arith.constant 0 : index
    %c0_81 = arith.constant 0 : index
    %71 = vector.load %arg11[%c0_80, %c0_81] : memref<2x2xf32, #tpu.memory_space<vmem>>, vector<2x2xf32>
    tpu.vector_store %arg11[%c0_80, %c0_81], %70 {strides = array<i32>} : memref<2x2xf32, #tpu.memory_space<vmem>>, vector<2x2xf32>,
    return
  }
}

</mosaic_0001>

<bundles_post_ra>
// kernel: mfcc_cnn_forward.1
= control target key start
LH: loop header
LB: loop body
LE: loop exit
PB: predicated region body
PF: predicated region fallthrough
CT: control target
= control target key end

     0   :  { %s3197_s21 = smov 8   ;;  %s3198_s22 = smov 24   ;;  %v3199_v4 = vmov 0.0|0.0   ;;  %vm3200_vm0 = vmmov 0   ;;  %v3201_v5 = vmov 0.0   ;;  %vm76_vm1 = vcmask 64512   ;;  %s4750_s0 = inlined_call_operand.vmem [shape: f32[296,8], index: 0, kind: input, shape index: {}]   ;;  %s4751_s1 = inlined_call_operand.vmem [shape: f32[40,32], index: 1, kind: input, shape index: {}]   ;;  %s4752_s2 = inlined_call_operand.vmem [shape: f32[1,32], index: 2, kind: input, shape index: {}]   ;;  %s4753_s3 = inlined_call_operand.vmem [shape: bf16[112,292], index: 3, kind: input, shape index: {}]   ;;  %s4754_s4 = inlined_call_operand.vmem [shape: f32[160,64], index: 4, kind: input, shape index: {}]   ;;  %s4755_s5 = inlined_call_operand.vmem [shape: f32[1,64], index: 5, kind: input, shape index: {}]   ;;  %s4756_s6 = inlined_call_operand.vmem [shape: bf16[16,52], index: 6, kind: input, shape index: {}]   ;;  %s4757_s7 = inlined_call_operand.vmem [shape: f32[256,128], index: 7, kind: input, shape index: {}]   ;;  %s4758_s8 = inlined_call_operand.vmem [shape: f32[1,128], index: 8, kind: input, shape index: {}]   ;;  %s4759_s9 = inlined_call_operand.vmem [shape: f32[128,2], index: 9, kind: input, shape index: {}]   ;;  %s4760_s10 = inlined_call_operand.vmem [shape: f32[1,2], index: 10, kind: input, shape index: {}]   ;;  %s4761_s11 = inlined_call_operand.hbm [shape: f32[2,2], index: 11, kind: output, shape index: {}]  }
   0x1   :  { %v115_v0 = vld [vmem:[%s4750_s0 + $0x1] sm:$0xff]  ;;  %3019 = vmatprep.subr.bf16.mxu0 %v3199_v4  ;;  %2825 = vmatprep.mubr.msk.f32.mxu0 %vm3200_vm0, %v3201_v5  ;;  %s3202_s27 = smov 16   ;;  %s3203_s28 = smov 32   ;;  %v116_v6 = vld [vmem:[%s4750_s0 + $0x9] sm:$0xff]  ;;  %v117_v10 = vld [vmem:[%s4750_s0 + $0x11] sm:$0xff] }
   0x2   :  { %v563_v1 = vld [vmem:[%s4750_s0 + $0x3] sm:$0xff]  ;;  %189 = vrot.lane.b32.xlu0 %v115_v0, %s3197_s21  ;;  %v564_v8 = vld [vmem:[%s4750_s0 + $0xb] sm:$0xff]  ;;  %v565_v12 = vld [vmem:[%s4750_s0 + $0x13] sm:$0xff] }
   0x3   :  { %637 = vrot.lane.b32.xlu1 %v563_v1, %s3198_s22  ;;  %v339_v2 = vld [vmem:[%s4750_s0 + $0x2] sm:$0xff]  ;;  %v340_v7 = vld [vmem:[%s4750_s0 + $0xa] sm:$0xff]  ;;  %v341_v11 = vld [vmem:[%s4750_s0 + $0x12] sm:$0xff] }
   0x4   :  { %v787_v3 = vld [vmem:[%s4750_s0 + $0x4] sm:$0xff]  ;;  %v788_v9 = vld [vmem:[%s4750_s0 + $0xc] sm:$0xff]  ;;  %v789_v13 = vld [vmem:[%s4750_s0 + $0x14] sm:$0xff] }
   0x5   :  { %v118_v14 = vld [vmem:[%s4750_s0 + $0x19] sm:$0xff]  ;;  %v1049_v18 = vld [vmem:[%s4751_s1 + $0x8] sm:$0xff]  ;;  %v1050_v21 = vld [vmem:[%s4751_s1 + $0x10] sm:$0xff] }
   0x6   :  { %413 = vrot.lane.b32.xlu0 %v339_v2, %s3202_s27  ;;  %v39_v15 = vld [vmem:[%s4750_s0] sm:$0xff]  ;;  %v40_v20 = vld [vmem:[%s4750_s0 + $0x8] sm:$0xff]  ;;  %v1051_v22 = vld [vmem:[%s4751_s1 + $0x18] sm:$0xff] }
   0x7   :  { %861 = vrot.lane.b32.xlu1 %v787_v3, %s3203_s28  ;;  %v342_v16 = vld [vmem:[%s4750_s0 + $0x1a] sm:$0xff]  ;;  %77 = vst.msk [vmem:[#allocation2] sm:$0xff] %vm76_vm1, %v39_v15  ;;  %78 = vst.msk [vmem:[#allocation2 + $0x8] sm:$0xff] %vm76_vm1, %v40_v20  ;;  %v3023_v25 = vpack.c.bf16 %v1051_v22, %v1050_v21  ;;  %v41_v26 = vld [vmem:[%s4750_s0 + $0x10] sm:$0xff] }
   0x8   :  { %v1048_v17 = vld [vmem:[%s4751_s1] sm:$0xff]  ;;  %79 = vst.msk [vmem:[#allocation2 + $0x10] sm:$0xff] %vm76_vm1, %v41_v26  ;;  %v42_v27 = vld [vmem:[%s4750_s0 + $0x18] sm:$0xff]  ;;  %v44_v32 = vld [vmem:[%s4750_s0 + $0x28] sm:$0xff] }
   0x9   :  { %v3020_v19 = vpack.c.bf16 %v1049_v18, %v1048_v17  ;;  %v566_v23 = vld [vmem:[%s4750_s0 + $0x1b] sm:$0xff]  ;;  %80 = vst.msk [vmem:[#allocation2 + $0x18] sm:$0xff] %vm76_vm1, %v42_v27  ;;  %v567_v33 = vld [vmem:[%s4750_s0 + $0x23] sm:$0xff]  ;;  %82 = vst.msk [vmem:[#allocation2 + $0x28] sm:$0xff] %vm76_vm1, %v44_v32 }
   0xa   :  { %191 = vrot.lane.b32.xlu0 %v116_v6, %s3197_s21  ;;  %v790_v24 = vld [vmem:[%s4750_s0 + $0x1c] sm:$0xff]  ;;  %v791_v34 = vld [vmem:[%s4750_s0 + $0x24] sm:$0xff]  ;;  %v45_v35 = vld [vmem:[%s4750_s0 + $0x30] sm:$0xff] }
   0xb   :  { %415 = vrot.lane.b32.xlu1 %v340_v7, %s3202_s27  ;;  %3021 = vmatpush3.bf16.msra.mxu0 %v3020_v19  ;;  %v119_v28 = vld [vmem:[%s4750_s0 + $0x21] sm:$0xff] }
   0xc   :  { %3022 = vmatprep.subr.bf16.mxu0 %v3199_v4  ;;  %v343_v29 = vld [vmem:[%s4750_s0 + $0x22] sm:$0xff] }
   0xd   :  { %v43_v30 = vld [vmem:[%s4750_s0 + $0x20] sm:$0xff] }
   0xe   :  { %639 = vrot.lane.b32.xlu0 %v564_v8, %s3198_s22  ;;  %v1052_v31 = vld [vmem:[%s4751_s1 + $0x20] sm:$0xff]  ;;  %81 = vst.msk [vmem:[#allocation2 + $0x20] sm:$0xff] %vm76_vm1, %v43_v30 }
   0xf   :  { %863 = vrot.lane.b32.xlu1 %v788_v9, %s3203_s28  ;;  %3024 = vmatpush3.bf16.msra.mxu0 %v3023_v25 }
  0x10   :  { %2823 = vmatprep.subr.mxu0 %v3201_v5 }
  0x12   :  { %193 = vrot.lane.b32.xlu0 %v117_v10, %s3197_s21 }
  0x13   :  { %417 = vrot.lane.b32.xlu1 %v341_v11, %s3202_s27  ;;  %2824 = vmatpush3.msra.mxu0 %v1052_v31 }
  0x16   :  { %641 = vrot.lane.b32.xlu0 %v565_v12, %s3198_s22 }
  0x17   :  { %865 = vrot.lane.b32.xlu1 %v789_v13, %s3203_s28 }
  0x1a   :  { %195 = vrot.lane.b32.xlu0 %v118_v14, %s3197_s21 }
  0x1b   :  { %419 = vrot.lane.b32.xlu1 %v342_v16, %s3202_s27 }
  0x1e   :  { %643 = vrot.lane.b32.xlu0 %v566_v23, %s3198_s22 }
  0x1f   :  { %867 = vrot.lane.b32.xlu1 %v790_v24, %s3203_s28 }
  0x22   :  { %197 = vrot.lane.b32.xlu0 %v119_v28, %s3197_s21 }
  0x23   :  { %421 = vrot.lane.b32.xlu1 %v343_v29, %s3202_s27 }
  0x24   :  { %16 = vsyncpa [#allocation8], 0  ;;  %83 = vst.msk [vmem:[#allocation2 + $0x30] sm:$0xff] %vm76_vm1, %v45_v35  ;;  %v120_v36 = vld [vmem:[%s4750_s0 + $0x29] sm:$0xff]  ;;  %v46_v40 = vld [vmem:[%s4750_s0 + $0x38] sm:$0xff]  ;;  %vm300_vm2 = vcmask 130112  }
  0x25   :  { %v344_v37 = vld [vmem:[%s4750_s0 + $0x2a] sm:$0xff]  ;;  %84 = vst.msk [vmem:[#allocation2 + $0x38] sm:$0xff] %vm76_vm1, %v46_v40  ;;  %v345_v42 = vld [vmem:[%s4750_s0 + $0x32] sm:$0xff]  ;;  %v47_v45 = vld [vmem:[%s4750_s0 + $0x40] sm:$0xff]  ;;  %vm524_vm3 = vcmask 195712   ;;  %vm748_vm4 = vcmask 261312  }
  0x26   :  { %645 = vrot.lane.b32.xlu0 %v567_v33, %s3198_s22  ;;  %v568_v38 = vld [vmem:[%s4750_s0 + $0x2b] sm:$0xff]  ;;  %v569_v43 = vld [vmem:[%s4750_s0 + $0x33] sm:$0xff]  ;;  %85 = vst.msk [vmem:[#allocation2 + $0x40] sm:$0xff] %vm76_vm1, %v47_v45  ;;  %v570_v48 = vld [vmem:[%s4750_s0 + $0x3b] sm:$0xff]  ;;  %vm972_vm5 = vcmask 326912   ;;  %vm1060_vm6 = vcmask 326656  }
  0x27   :  { %869 = vrot.lane.b32.xlu1 %v791_v34, %s3203_s28  ;;  %v792_v39 = vld [vmem:[%s4750_s0 + $0x2c] sm:$0xff]  ;;  %v793_v44 = vld [vmem:[%s4750_s0 + $0x34] sm:$0xff]  ;;  %v794_v49 = vld [vmem:[%s4750_s0 + $0x3c] sm:$0xff]  ;;  %vm113_vm7 = vcmask 60416   ;;  %vm337_vm8 = vcmask 126016   ;;  %vm561_vm9 = vcmask 191616  }
  0x28   :  { %v121_v41 = vld [vmem:[%s4750_s0 + $0x31] sm:$0xff]  ;;  %v122_v46 = vld [vmem:[%s4750_s0 + $0x39] sm:$0xff]  ;;  %v48_v50 = vld [vmem:[%s4750_s0 + $0x48] sm:$0xff]  ;;  %vm785_vm10 = vcmask 257216   ;;  %vm1009_vm11 = vcmask 322816   ;;  %vm1572_vm12 = vcmask 1043456  }
  0x29   :  { %v346_v47 = vld [vmem:[%s4750_s0 + $0x3a] sm:$0xff]  ;;  %86 = vst.msk [vmem:[#allocation2 + $0x48] sm:$0xff] %vm76_vm1, %v48_v50  ;;  %v347_v52 = vld [vmem:[%s4750_s0 + $0x42] sm:$0xff]  ;;  %v49_v55 = vld [vmem:[%s4750_s0 + $0x50] sm:$0xff]  ;;  %vm1529_vm13 = vcmask 293888   ;;  %vm1853_vm14 = vcmask 261120  }
  0x2a   :  { %199 = vrot.lane.b32.xlu0 %v120_v36, %s3197_s21  ;;  %v123_v51 = vld [vmem:[%s4750_s0 + $0x41] sm:$0xff]  ;;  %87 = vst.msk [vmem:[#allocation2 + $0x50] sm:$0xff] %vm76_vm1, %v49_v55  ;;  %v124_v56 = vld [vmem:[%s4750_s0 + $0x49] sm:$0xff]  ;;  %v50_v60 = vld [vmem:[%s4750_s0 + $0x58] sm:$0xff]  ;;  %s3204_s15 = smov 64   ;;  %vm1874_vm15 = vcmask 257024  }
  0x2b   :  { %423 = vrot.lane.b32.xlu1 %v344_v37, %s3202_s27  ;;  %v571_v53 = vld [vmem:[%s4750_s0 + $0x43] sm:$0xff]  ;;  %v572_v58 = vld [vmem:[%s4750_s0 + $0x4b] sm:$0xff]  ;;  %88 = vst.msk [vmem:[#allocation2 + $0x58] sm:$0xff] %vm76_vm1, %v50_v60  ;;  %v573_v63 = vld [vmem:[%s4750_s0 + $0x53] sm:$0xff] }
  0x2c   :  { %v795_v54 = vld [vmem:[%s4750_s0 + $0x44] sm:$0xff]  ;;  %v796_v59 = vld [vmem:[%s4750_s0 + $0x4c] sm:$0xff]  ;;  %v797_v0 = vld [vmem:[%s4750_s0 + $0x54] sm:$0xff] }
  0x2d   :  { %v348_v57 = vld [vmem:[%s4750_s0 + $0x4a] sm:$0xff]  ;;  %v349_v62 = vld [vmem:[%s4750_s0 + $0x52] sm:$0xff]  ;;  %v51_v1 = vld [vmem:[%s4750_s0 + $0x60] sm:$0xff] }
  0x2e   :  { %647 = vrot.lane.b32.xlu0 %v568_v38, %s3198_s22  ;;  %v125_v61 = vld [vmem:[%s4750_s0 + $0x51] sm:$0xff]  ;;  %89 = vst.msk [vmem:[#allocation2 + $0x60] sm:$0xff] %vm76_vm1, %v51_v1  ;;  %v126_v2 = vld [vmem:[%s4750_s0 + $0x59] sm:$0xff]  ;;  %v52_v8 = vld [vmem:[%s4750_s0 + $0x68] sm:$0xff] }
  0x2f   :  { %871 = vrot.lane.b32.xlu1 %v792_v39, %s3203_s28  ;;  %v350_v3 = vld [vmem:[%s4750_s0 + $0x5a] sm:$0xff]  ;;  %90 = vst.msk [vmem:[#allocation2 + $0x68] sm:$0xff] %vm76_vm1, %v52_v8  ;;  %v351_v10 = vld [vmem:[%s4750_s0 + $0x62] sm:$0xff]  ;;  %v53_v13 = vld [vmem:[%s4750_s0 + $0x70] sm:$0xff] }
  0x30   :  { %v574_v6 = vld [vmem:[%s4750_s0 + $0x5b] sm:$0xff]  ;;  %v575_v11 = vld [vmem:[%s4750_s0 + $0x63] sm:$0xff]  ;;  %91 = vst.msk [vmem:[#allocation2 + $0x70] sm:$0xff] %vm76_vm1, %v53_v13  ;;  %v576_v16 = vld [vmem:[%s4750_s0 + $0x6b] sm:$0xff] }
  0x31   :  { %v798_v7 = vld [vmem:[%s4750_s0 + $0x5c] sm:$0xff]  ;;  %v799_v12 = vld [vmem:[%s4750_s0 + $0x64] sm:$0xff]  ;;  %v800_v17 = vld [vmem:[%s4750_s0 + $0x6c] sm:$0xff] }
  0x32   :  { %201 = vrot.lane.b32.xlu0 %v121_v41, %s3197_s21  ;;  %v127_v9 = vld [vmem:[%s4750_s0 + $0x61] sm:$0xff]  ;;  %v128_v14 = vld [vmem:[%s4750_s0 + $0x69] sm:$0xff]  ;;  %v54_v18 = vld [vmem:[%s4750_s0 + $0x78] sm:$0xff] }
  0x33   :  { %425 = vrot.lane.b32.xlu1 %v345_v42, %s3202_s27  ;;  %v352_v15 = vld [vmem:[%s4750_s0 + $0x6a] sm:$0xff]  ;;  %92 = vst.msk [vmem:[#allocation2 + $0x78] sm:$0xff] %vm76_vm1, %v54_v18  ;;  %v353_v20 = vld [vmem:[%s4750_s0 + $0x72] sm:$0xff]  ;;  %v55_v23 = vld [vmem:[%s4750_s0 + $0x80] sm:$0xff] }
  0x34   :  { %v129_v19 = vld [vmem:[%s4750_s0 + $0x71] sm:$0xff]  ;;  %93 = vst.msk [vmem:[#allocation2 + $0x80] sm:$0xff] %vm76_vm1, %v55_v23  ;;  %v130_v26 = vld [vmem:[%s4750_s0 + $0x79] sm:$0xff]  ;;  %v56_v32 = vld [vmem:[%s4750_s0 + $0x88] sm:$0xff] }
  0x35   :  { %v577_v21 = vld [vmem:[%s4750_s0 + $0x73] sm:$0xff]  ;;  %v578_v30 = vld [vmem:[%s4750_s0 + $0x7b] sm:$0xff]  ;;  %94 = vst.msk [vmem:[#allocation2 + $0x88] sm:$0xff] %vm76_vm1, %v56_v32  ;;  %v579_v40 = vld [vmem:[%s4750_s0 + $0x83] sm:$0xff] }
  0x36   :  { %649 = vrot.lane.b32.xlu0 %v569_v43, %s3198_s22  ;;  %v801_v22 = vld [vmem:[%s4750_s0 + $0x74] sm:$0xff]  ;;  %v802_v31 = vld [vmem:[%s4750_s0 + $0x7c] sm:$0xff]  ;;  %v803_v41 = vld [vmem:[%s4750_s0 + $0x84] sm:$0xff] }
  0x37   :  { %873 = vrot.lane.b32.xlu1 %v793_v44, %s3203_s28  ;;  %v354_v27 = vld [vmem:[%s4750_s0 + $0x7a] sm:$0xff]  ;;  %v355_v36 = vld [vmem:[%s4750_s0 + $0x82] sm:$0xff]  ;;  %v57_v42 = vld [vmem:[%s4750_s0 + $0x90] sm:$0xff] }
  0x38   :  { %v131_v35 = vld [vmem:[%s4750_s0 + $0x81] sm:$0xff]  ;;  %95 = vst.msk [vmem:[#allocation2 + $0x90] sm:$0xff] %vm76_vm1, %v57_v42  ;;  %v132_v45 = vld [vmem:[%s4750_s0 + $0x89] sm:$0xff]  ;;  %v133_v55 = vld [vmem:[%s4750_s0 + $0x91] sm:$0xff] }
  0x39   :  { %v580_v50 = vld [vmem:[%s4750_s0 + $0x8b] sm:$0xff]  ;;  %v581_v60 = vld [vmem:[%s4750_s0 + $0x93] sm:$0xff]  ;;  %v582_v8 = vld [vmem:[%s4750_s0 + $0x9b] sm:$0xff] }
  0x3a   :  { %203 = vrot.lane.b32.xlu0 %v122_v46, %s3197_s21  ;;  %v134_v1 = vld [vmem:[%s4750_s0 + $0x99] sm:$0xff]  ;;  %v135_v13 = vld [vmem:[%s4750_s0 + $0xa1] sm:$0xff]  ;;  %v136_v23 = vld [vmem:[%s4750_s0 + $0xa9] sm:$0xff] }
  0x3b   :  { %427 = vrot.lane.b32.xlu1 %v346_v47, %s3202_s27  ;;  %v583_v18 = vld [vmem:[%s4750_s0 + $0xa3] sm:$0xff]  ;;  %v808_v32 = vld [vmem:[%s4750_s0 + $0xac] sm:$0xff]  ;;  %v809_v42 = vld [vmem:[%s4750_s0 + $0xb4] sm:$0xff] }
  0x3e   :  { %651 = vrot.lane.b32.xlu0 %v570_v48, %s3198_s22  ;;  %v356_v48 = vld [vmem:[%s4750_s0 + $0x8a] sm:$0xff] }
  0x3f   :  { %875 = vrot.lane.b32.xlu1 %v794_v49, %s3203_s28 }
  0x42   :  { %205 = vrot.lane.b32.xlu0 %v123_v51, %s3197_s21  ;;  %v58_v51 = vld [vmem:[%s4750_s0 + $0x98] sm:$0xff] }
  0x43   :  { %429 = vrot.lane.b32.xlu1 %v347_v52, %s3202_s27  ;;  %96 = vst.msk [vmem:[#allocation2 + $0x98] sm:$0xff] %vm76_vm1, %v58_v51 }
  0x46   :  { %653 = vrot.lane.b32.xlu0 %v571_v53, %s3198_s22 }
  0x47   :  { %877 = vrot.lane.b32.xlu1 %v795_v54, %s3203_s28  ;;  %v804_v54 = vld [vmem:[%s4750_s0 + $0x8c] sm:$0xff] }
  0x4a   :  { %207 = vrot.lane.b32.xlu0 %v124_v56, %s3197_s21 }
  0x4b   :  { %431 = vrot.lane.b32.xlu1 %v348_v57, %s3202_s27 }
  0x4e   :  { %655 = vrot.lane.b32.xlu0 %v572_v58, %s3198_s22  ;;  %v357_v58 = vld [vmem:[%s4750_s0 + $0x92] sm:$0xff] }
  0x4f   :  { %879 = vrot.lane.b32.xlu1 %v796_v59, %s3203_s28 }
  0x52   :  { %209 = vrot.lane.b32.xlu0 %v125_v61, %s3197_s21  ;;  %v59_v61 = vld [vmem:[%s4750_s0 + $0xa0] sm:$0xff] }
  0x53   :  { %433 = vrot.lane.b32.xlu1 %v349_v62, %s3202_s27  ;;  %97 = vst.msk [vmem:[#allocation2 + $0xa0] sm:$0xff] %vm76_vm1, %v59_v61 }
  0x56   :  { %657 = vrot.lane.b32.xlu0 %v573_v63, %s3198_s22 }
  0x57   :  { %881 = vrot.lane.b32.xlu1 %v797_v0, %s3203_s28  ;;  %v805_v0 = vld [vmem:[%s4750_s0 + $0x94] sm:$0xff] }
  0x5a   :  { %211 = vrot.lane.b32.xlu0 %v126_v2, %s3197_s21 }
  0x5b   :  { %435 = vrot.lane.b32.xlu1 %v350_v3, %s3202_s27 }
  0x5e   :  { %659 = vrot.lane.b32.xlu0 %v574_v6, %s3198_s22  ;;  %v358_v6 = vld [vmem:[%s4750_s0 + $0x9a] sm:$0xff] }
  0x5f   :  { %883 = vrot.lane.b32.xlu1 %v798_v7, %s3203_s28 }
  0x62   :  { %213 = vrot.lane.b32.xlu0 %v127_v9, %s3197_s21  ;;  %v60_v9 = vld [vmem:[%s4750_s0 + $0xa8] sm:$0xff] }
  0x63   :  { %437 = vrot.lane.b32.xlu1 %v351_v10, %s3202_s27  ;;  %98 = vst.msk [vmem:[#allocation2 + $0xa8] sm:$0xff] %vm76_vm1, %v60_v9 }
  0x66   :  { %661 = vrot.lane.b32.xlu0 %v575_v11, %s3198_s22 }
  0x67   :  { %885 = vrot.lane.b32.xlu1 %v799_v12, %s3203_s28  ;;  %v806_v12 = vld [vmem:[%s4750_s0 + $0x9c] sm:$0xff] }
  0x6a   :  { %215 = vrot.lane.b32.xlu0 %v128_v14, %s3197_s21 }
  0x6b   :  { %439 = vrot.lane.b32.xlu1 %v352_v15, %s3202_s27 }
  0x6e   :  { %663 = vrot.lane.b32.xlu0 %v576_v16, %s3198_s22  ;;  %v359_v16 = vld [vmem:[%s4750_s0 + $0xa2] sm:$0xff] }
  0x6f   :  { %887 = vrot.lane.b32.xlu1 %v800_v17, %s3203_s28 }
  0x72   :  { %217 = vrot.lane.b32.xlu0 %v129_v19, %s3197_s21  ;;  %v61_v19 = vld [vmem:[%s4750_s0 + $0xb0] sm:$0xff] }
  0x73   :  { %441 = vrot.lane.b32.xlu1 %v353_v20, %s3202_s27  ;;  %99 = vst.msk [vmem:[#allocation2 + $0xb0] sm:$0xff] %vm76_vm1, %v61_v19 }
  0x74   :  { %v190_v24 = vpop.permute.xlu0 %189 }
  0x75   :  { %v638_v25 = vpop.permute.xlu1 %637  ;;  %301 = vst.msk [vmem:[#allocation2] sm:$0xff] %vm300_vm2, %v190_v24 }
  0x76   :  { %665 = vrot.lane.b32.xlu0 %v577_v21, %s3198_s22 }
  0x77   :  { %889 = vrot.lane.b32.xlu1 %v801_v22, %s3203_s28  ;;  %v807_v22 = vld [vmem:[%s4750_s0 + $0xa4] sm:$0xff] }
  0x78   :  { %v414_v28 = vpop.permute.xlu0 %413 }
  0x79   :  { %v862_v29 = vpop.permute.xlu1 %861  ;;  %525 = vst.msk [vmem:[#allocation2] sm:$0xff] %vm524_vm3, %v414_v28  ;;  %v584_v28 = vld [vmem:[%s4750_s0 + $0xab] sm:$0xff] }
  0x7a   :  { %749 = vst.msk [vmem:[#allocation2] sm:$0xff] %vm748_vm4, %v638_v25  ;;  %219 = vrot.lane.b32.xlu0 %v130_v26, %s3197_s21  ;;  %v360_v26 = vld [vmem:[%s4750_s0 + $0xaa] sm:$0xff] }
  0x7b   :  { %443 = vrot.lane.b32.xlu1 %v354_v27, %s3202_s27  ;;  %973 = vst.msk [vmem:[#allocation2] sm:$0xff] %vm972_vm5, %v862_v29  ;;  %v62_v29 = vld [vmem:[%s4750_s0 + $0xb8] sm:$0xff] }
  0x7c   :  { %v192_v33 = vpop.permute.xlu0 %191  ;;  %100 = vst.msk [vmem:[#allocation2 + $0xb8] sm:$0xff] %vm76_vm1, %v62_v29 }
  0x7d   :  { %v416_v34 = vpop.permute.xlu1 %415  ;;  %302 = vst.msk [vmem:[#allocation2 + $0x8] sm:$0xff] %vm300_vm2, %v192_v33  ;;  %v137_v33 = vld [vmem:[%s4750_s0 + $0xb1] sm:$0xff] }
  0x7e   :  { %526 = vst.msk [vmem:[#allocation2 + $0x8] sm:$0xff] %vm524_vm3, %v416_v34  ;;  %667 = vrot.lane.b32.xlu0 %v578_v30, %s3198_s22 }
  0x7f   :  { %891 = vrot.lane.b32.xlu1 %v802_v31, %s3203_s28 }
  0x80   :  { %v640_v37 = vpop.permute.xlu0 %639 }
  0x81   :  { %v864_v38 = vpop.permute.xlu1 %863  ;;  %750 = vst.msk [vmem:[#allocation2 + $0x8] sm:$0xff] %vm748_vm4, %v640_v37 }
  0x82   :  { %974 = vst.msk [vmem:[#allocation2 + $0x8] sm:$0xff] %vm972_vm5, %v864_v38  ;;  %221 = vrot.lane.b32.xlu0 %v131_v35, %s3197_s21  ;;  %v1011_v39 = vld [vmem:[#allocation2] sm:$0xff]  ;;  %v585_v38 = vld [vmem:[%s4750_s0 + $0xb3] sm:$0xff] }
  0x83   :  { %445 = vrot.lane.b32.xlu1 %v355_v36, %s3202_s27  ;;  %2826 = vmatmul.mubr.msk.f32.vlgmr.msra.gmra.mrb[0].mxu0 %vm1060_vm6, %v1011_v39  ;;  %v361_v36 = vld [vmem:[%s4750_s0 + $0xb2] sm:$0xff]  ;;  %v63_v39 = vld [vmem:[%s4750_s0 + $0xc0] sm:$0xff] }
  0x84   :  { %v194_v43 = vpop.permute.xlu0 %193  ;;  %2828 = vmatprep.mubr.msk.f32.mxu0 %vm3200_vm0, %v3201_v5  ;;  %101 = vst.msk [vmem:[#allocation2 + $0xc0] sm:$0xff] %vm76_vm1, %v63_v39 }
  0x85   :  { %v418_v44 = vpop.permute.xlu1 %417  ;;  %303 = vst.msk [vmem:[#allocation2 + $0x10] sm:$0xff] %vm300_vm2, %v194_v43  ;;  %v138_v43 = vld [vmem:[%s4750_s0 + $0xb9] sm:$0xff] }
  0x86   :  { %527 = vst.msk [vmem:[#allocation2 + $0x10] sm:$0xff] %vm524_vm3, %v418_v44  ;;  %669 = vrot.lane.b32.xlu0 %v579_v40, %s3198_s22 }
  0x87   :  { %893 = vrot.lane.b32.xlu1 %v803_v41, %s3203_s28 }
  0x88   :  { %v642_v46 = vpop.permute.xlu0 %641 }
  0x89   :  { %v866_v47 = vpop.permute.xlu1 %865  ;;  %751 = vst.msk [vmem:[#allocation2 + $0x10] sm:$0xff] %vm748_vm4, %v642_v46  ;;  %v1012_v49 = vld [vmem:[#allocation2 + $0x8] sm:$0xff]  ;;  %v362_v46 = vld [vmem:[%s4750_s0 + $0xba] sm:$0xff] }
  0x8a   :  { %975 = vst.msk [vmem:[#allocation2 + $0x10] sm:$0xff] %vm972_vm5, %v866_v47  ;;  %223 = vrot.lane.b32.xlu0 %v132_v45, %s3197_s21  ;;  %2829 = vmatmul.mubr.msk.f32.gmra.mrb[2].mxu0 %vm1060_vm6, %v1012_v49  ;;  %v64_v49 = vld [vmem:[%s4750_s0 + $0xc8] sm:$0xff] }
  0x8b   :  { %447 = vrot.lane.b32.xlu1 %v356_v48, %s3202_s27  ;;  %2831 = vmatprep.mubr.msk.f32.mxu0 %vm3200_vm0, %v3201_v5  ;;  %v586_v48 = vld [vmem:[%s4750_s0 + $0xbb] sm:$0xff]  ;;  %102 = vst.msk [vmem:[#allocation2 + $0xc8] sm:$0xff] %vm76_vm1, %v64_v49 }
  0x8c   :  { %v196_v52 = vpop.permute.xlu0 %195 }
  0x8d   :  { %v420_v53 = vpop.permute.xlu1 %419  ;;  %304 = vst.msk [vmem:[#allocation2 + $0x18] sm:$0xff] %vm300_vm2, %v196_v52  ;;  %v810_v52 = vld [vmem:[%s4750_s0 + $0xbc] sm:$0xff] }
  0x8e   :  { %528 = vst.msk [vmem:[#allocation2 + $0x18] sm:$0xff] %vm524_vm3, %v420_v53  ;;  %671 = vrot.lane.b32.xlu0 %v580_v50, %s3198_s22  ;;  %v139_v53 = vld [vmem:[%s4750_s0 + $0xc1] sm:$0xff] }
  0x8f   :  { %895 = vrot.lane.b32.xlu1 %v804_v54, %s3203_s28 }
  0x90   :  { %v644_v56 = vpop.permute.xlu0 %643 }
  0x91   :  { %v868_v57 = vpop.permute.xlu1 %867  ;;  %752 = vst.msk [vmem:[#allocation2 + $0x18] sm:$0xff] %vm748_vm4, %v644_v56  ;;  %v1013_v59 = vld [vmem:[#allocation2 + $0x10] sm:$0xff]  ;;  %v363_v56 = vld [vmem:[%s4750_s0 + $0xc2] sm:$0xff] }
  0x92   :  { %976 = vst.msk [vmem:[#allocation2 + $0x18] sm:$0xff] %vm972_vm5, %v868_v57  ;;  %225 = vrot.lane.b32.xlu0 %v133_v55, %s3197_s21  ;;  %2832 = vmatmul.mubr.msk.f32.gmra.mrb[4].mxu0 %vm1060_vm6, %v1013_v59  ;;  %v65_v59 = vld [vmem:[%s4750_s0 + $0xd0] sm:$0xff] }
  0x93   :  { %449 = vrot.lane.b32.xlu1 %v357_v58, %s3202_s27  ;;  %2834 = vmatprep.mubr.msk.f32.mxu0 %vm3200_vm0, %v3201_v5  ;;  %v587_v58 = vld [vmem:[%s4750_s0 + $0xc3] sm:$0xff]  ;;  %103 = vst.msk [vmem:[#allocation2 + $0xd0] sm:$0xff] %vm76_vm1, %v65_v59  ;;  %v817_v59 = vld [vmem:[%s4750_s0 + $0xf4] sm:$0xff] }
  0x94   :  { %v198_v62 = vpop.permute.xlu0 %197 }
  0x95   :  { %v422_v63 = vpop.permute.xlu1 %421  ;;  %305 = vst.msk [vmem:[#allocation2 + $0x20] sm:$0xff] %vm300_vm2, %v198_v62  ;;  %v811_v62 = vld [vmem:[%s4750_s0 + $0xc4] sm:$0xff] }
  0x96   :  { %529 = vst.msk [vmem:[#allocation2 + $0x20] sm:$0xff] %vm524_vm3, %v422_v63  ;;  %673 = vrot.lane.b32.xlu0 %v581_v60, %s3198_s22  ;;  %v140_v63 = vld [vmem:[%s4750_s0 + $0xc9] sm:$0xff] }
  0x97   :  { %897 = vrot.lane.b32.xlu1 %v805_v0, %s3203_s28 }
  0x98   :  { %v646_v2 = vpop.permute.xlu0 %645 }
  0x99   :  { %v870_v3 = vpop.permute.xlu1 %869  ;;  %753 = vst.msk [vmem:[#allocation2 + $0x20] sm:$0xff] %vm748_vm4, %v646_v2  ;;  %v1014_v7 = vld [vmem:[#allocation2 + $0x18] sm:$0xff]  ;;  %v364_v2 = vld [vmem:[%s4750_s0 + $0xca] sm:$0xff] }
  0x9a   :  { %977 = vst.msk [vmem:[#allocation2 + $0x20] sm:$0xff] %vm972_vm5, %v870_v3  ;;  %227 = vrot.lane.b32.xlu0 %v134_v1, %s3197_s21  ;;  %2835 = vmatmul.mubr.msk.f32.gmra.mrb[6].mxu0 %vm1060_vm6, %v1014_v7  ;;  %v66_v7 = vld [vmem:[%s4750_s0 + $0xd8] sm:$0xff] }
  0x9b   :  { %451 = vrot.lane.b32.xlu1 %v358_v6, %s3202_s27  ;;  %2837 = vmatprep.mubr.msk.f32.mxu0 %vm3200_vm0, %v3201_v5  ;;  %v588_v6 = vld [vmem:[%s4750_s0 + $0xcb] sm:$0xff]  ;;  %104 = vst.msk [vmem:[#allocation2 + $0xd8] sm:$0xff] %vm76_vm1, %v66_v7 }
  0x9c   :  { %v200_v10 = vpop.permute.xlu0 %199  ;;  %v72_v7 = vld [vmem:[%s4750_s0 + $0x108] sm:$0xff] }
  0x9d   :  { %v424_v11 = vpop.permute.xlu1 %423  ;;  %306 = vst.msk [vmem:[#allocation2 + $0x28] sm:$0xff] %vm300_vm2, %v200_v10  ;;  %v812_v10 = vld [vmem:[%s4750_s0 + $0xcc] sm:$0xff] }
  0x9e   :  { %530 = vst.msk [vmem:[#allocation2 + $0x28] sm:$0xff] %vm524_vm3, %v424_v11  ;;  %675 = vrot.lane.b32.xlu0 %v582_v8, %s3198_s22  ;;  %v141_v11 = vld [vmem:[%s4750_s0 + $0xd1] sm:$0xff] }
  0x9f   :  { %899 = vrot.lane.b32.xlu1 %v806_v12, %s3203_s28  ;;  %110 = vst.msk [vmem:[#allocation2 + $0x108] sm:$0xff] %vm76_vm1, %v72_v7 }
  0xa0   :  { %v648_v14 = vpop.permute.xlu0 %647 }
  0xa1   :  { %v872_v15 = vpop.permute.xlu1 %871  ;;  %754 = vst.msk [vmem:[#allocation2 + $0x28] sm:$0xff] %vm748_vm4, %v648_v14  ;;  %v1015_v17 = vld [vmem:[#allocation2 + $0x20] sm:$0xff]  ;;  %v365_v14 = vld [vmem:[%s4750_s0 + $0xd2] sm:$0xff] }
  0xa2   :  { %978 = vst.msk [vmem:[#allocation2 + $0x28] sm:$0xff] %vm972_vm5, %v872_v15  ;;  %229 = vrot.lane.b32.xlu0 %v135_v13, %s3197_s21  ;;  %2838 = vmatmul.mubr.msk.f32.gmra.mrb[8].mxu0 %vm1060_vm6, %v1015_v17  ;;  %v67_v17 = vld [vmem:[%s4750_s0 + $0xe0] sm:$0xff] }
  0xa3   :  { %453 = vrot.lane.b32.xlu1 %v359_v16, %s3202_s27  ;;  %2840 = vmatprep.mubr.msk.f32.mxu0 %vm3200_vm0, %v3201_v5  ;;  %v589_v16 = vld [vmem:[%s4750_s0 + $0xd3] sm:$0xff]  ;;  %105 = vst.msk [vmem:[#allocation2 + $0xe0] sm:$0xff] %vm76_vm1, %v67_v17 }
  0xa4   :  { %v202_v20 = vpop.permute.xlu0 %201  ;;  %v73_v17 = vld [vmem:[%s4750_s0 + $0x110] sm:$0xff] }
  0xa5   :  { %v426_v21 = vpop.permute.xlu1 %425  ;;  %307 = vst.msk [vmem:[#allocation2 + $0x30] sm:$0xff] %vm300_vm2, %v202_v20  ;;  %v813_v20 = vld [vmem:[%s4750_s0 + $0xd4] sm:$0xff] }
  0xa6   :  { %531 = vst.msk [vmem:[#allocation2 + $0x30] sm:$0xff] %vm524_vm3, %v426_v21  ;;  %677 = vrot.lane.b32.xlu0 %v583_v18, %s3198_s22  ;;  %v142_v21 = vld [vmem:[%s4750_s0 + $0xd9] sm:$0xff] }
  0xa7   :  { %901 = vrot.lane.b32.xlu1 %v807_v22, %s3203_s28  ;;  %111 = vst.msk [vmem:[#allocation2 + $0x110] sm:$0xff] %vm76_vm1, %v73_v17 }
  0xa8   :  { %v650_v24 = vpop.permute.xlu0 %649 }
  0xa9   :  { %v874_v25 = vpop.permute.xlu1 %873  ;;  %755 = vst.msk [vmem:[#allocation2 + $0x30] sm:$0xff] %vm748_vm4, %v650_v24  ;;  %v1016_v27 = vld [vmem:[#allocation2 + $0x28] sm:$0xff]  ;;  %v366_v24 = vld [vmem:[%s4750_s0 + $0xda] sm:$0xff] }
  0xaa   :  { %979 = vst.msk [vmem:[#allocation2 + $0x30] sm:$0xff] %vm972_vm5, %v874_v25  ;;  %231 = vrot.lane.b32.xlu0 %v136_v23, %s3197_s21  ;;  %2841 = vmatmul.mubr.msk.f32.gmra.mrb[10].mxu0 %vm1060_vm6, %v1016_v27  ;;  %v68_v27 = vld [vmem:[%s4750_s0 + $0xe8] sm:$0xff] }
  0xab   :  { %455 = vrot.lane.b32.xlu1 %v360_v26, %s3202_s27  ;;  %2843 = vmatprep.mubr.msk.f32.mxu0 %vm3200_vm0, %v3201_v5  ;;  %v590_v26 = vld [vmem:[%s4750_s0 + $0xdb] sm:$0xff]  ;;  %106 = vst.msk [vmem:[#allocation2 + $0xe8] sm:$0xff] %vm76_vm1, %v68_v27 }
  0xac   :  { %v204_v30 = vpop.permute.xlu0 %203  ;;  %v74_v27 = vld [vmem:[%s4750_s0 + $0x118] sm:$0xff] }
  0xad   :  { %v428_v31 = vpop.permute.xlu1 %427  ;;  %308 = vst.msk [vmem:[#allocation2 + $0x38] sm:$0xff] %vm300_vm2, %v204_v30  ;;  %v814_v30 = vld [vmem:[%s4750_s0 + $0xdc] sm:$0xff] }
  0xae   :  { %532 = vst.msk [vmem:[#allocation2 + $0x38] sm:$0xff] %vm524_vm3, %v428_v31  ;;  %679 = vrot.lane.b32.xlu0 %v584_v28, %s3198_s22  ;;  %v143_v31 = vld [vmem:[%s4750_s0 + $0xe1] sm:$0xff] }
  0xaf   :  { %903 = vrot.lane.b32.xlu1 %v808_v32, %s3203_s28  ;;  %112 = vst.msk [vmem:[#allocation2 + $0x118] sm:$0xff] %vm76_vm1, %v74_v27 }
  0xb0   :  { %v652_v34 = vpop.permute.xlu0 %651 }
  0xb1   :  { %v876_v35 = vpop.permute.xlu1 %875  ;;  %756 = vst.msk [vmem:[#allocation2 + $0x38] sm:$0xff] %vm748_vm4, %v652_v34  ;;  %v1017_v37 = vld [vmem:[#allocation2 + $0x30] sm:$0xff]  ;;  %v367_v34 = vld [vmem:[%s4750_s0 + $0xe2] sm:$0xff] }
  0xb2   :  { %980 = vst.msk [vmem:[#allocation2 + $0x38] sm:$0xff] %vm972_vm5, %v876_v35  ;;  %233 = vrot.lane.b32.xlu0 %v137_v33, %s3197_s21  ;;  %2844 = vmatmul.mubr.msk.f32.gmra.mrb[12].mxu0 %vm1060_vm6, %v1017_v37  ;;  %v69_v37 = vld [vmem:[%s4750_s0 + $0xf0] sm:$0xff] }
  0xb3   :  { %457 = vrot.lane.b32.xlu1 %v361_v36, %s3202_s27  ;;  %2846 = vmatprep.mubr.msk.f32.mxu0 %vm3200_vm0, %v3201_v5  ;;  %v591_v36 = vld [vmem:[%s4750_s0 + $0xe3] sm:$0xff]  ;;  %107 = vst.msk [vmem:[#allocation2 + $0xf0] sm:$0xff] %vm76_vm1, %v69_v37 }
  0xb4   :  { %v206_v40 = vpop.permute.xlu0 %205 }
  0xb5   :  { %v430_v41 = vpop.permute.xlu1 %429  ;;  %309 = vst.msk [vmem:[#allocation2 + $0x40] sm:$0xff] %vm300_vm2, %v206_v40  ;;  %v815_v40 = vld [vmem:[%s4750_s0 + $0xe4] sm:$0xff] }
  0xb6   :  { %533 = vst.msk [vmem:[#allocation2 + $0x40] sm:$0xff] %vm524_vm3, %v430_v41  ;;  %681 = vrot.lane.b32.xlu0 %v585_v38, %s3198_s22  ;;  %v144_v41 = vld [vmem:[%s4750_s0 + $0xe9] sm:$0xff] }
  0xb7   :  { %905 = vrot.lane.b32.xlu1 %v809_v42, %s3203_s28 }
  0xb8   :  { %v654_v44 = vpop.permute.xlu0 %653 }
  0xb9   :  { %v878_v45 = vpop.permute.xlu1 %877  ;;  %757 = vst.msk [vmem:[#allocation2 + $0x40] sm:$0xff] %vm748_vm4, %v654_v44  ;;  %v1018_v47 = vld [vmem:[#allocation2 + $0x38] sm:$0xff]  ;;  %v368_v44 = vld [vmem:[%s4750_s0 + $0xea] sm:$0xff] }
  0xba   :  { %981 = vst.msk [vmem:[#allocation2 + $0x40] sm:$0xff] %vm972_vm5, %v878_v45  ;;  %235 = vrot.lane.b32.xlu0 %v138_v43, %s3197_s21  ;;  %2847 = vmatmul.mubr.msk.f32.gmra.mrb[14].mxu0 %vm1060_vm6, %v1018_v47  ;;  %v70_v47 = vld [vmem:[%s4750_s0 + $0xf8] sm:$0xff] }
  0xbb   :  { %459 = vrot.lane.b32.xlu1 %v362_v46, %s3202_s27  ;;  %2849 = vmatprep.mubr.msk.f32.mxu0 %vm3200_vm0, %v3201_v5  ;;  %v592_v46 = vld [vmem:[%s4750_s0 + $0xeb] sm:$0xff]  ;;  %108 = vst.msk [vmem:[#allocation2 + $0xf8] sm:$0xff] %vm76_vm1, %v70_v47  ;;  %v151_v47 = vld [vmem:[%s4750_s0 + $0x121] sm:$0xf] }
  0xbc   :  { %v208_v50 = vpop.permute.xlu0 %207 }
  0xbd   :  { %v432_v51 = vpop.permute.xlu1 %431  ;;  %310 = vst.msk [vmem:[#allocation2 + $0x48] sm:$0xff] %vm300_vm2, %v208_v50  ;;  %v816_v50 = vld [vmem:[%s4750_s0 + $0xec] sm:$0xff] }
  0xbe   :  { %534 = vst.msk [vmem:[#allocation2 + $0x48] sm:$0xff] %vm524_vm3, %v432_v51  ;;  %683 = vrot.lane.b32.xlu0 %v586_v48, %s3198_s22  ;;  %v145_v51 = vld [vmem:[%s4750_s0 + $0xf1] sm:$0xff] }
  0xbf   :  { %907 = vrot.lane.b32.xlu1 %v810_v52, %s3203_s28 }
  0xc0   :  { %v656_v54 = vpop.permute.xlu0 %655 }
  0xc1   :  { %v880_v55 = vpop.permute.xlu1 %879  ;;  %758 = vst.msk [vmem:[#allocation2 + $0x48] sm:$0xff] %vm748_vm4, %v656_v54  ;;  %v1019_v57 = vld [vmem:[#allocation2 + $0x40] sm:$0xff]  ;;  %v369_v54 = vld [vmem:[%s4750_s0 + $0xf2] sm:$0xff] }
  0xc2   :  { %982 = vst.msk [vmem:[#allocation2 + $0x48] sm:$0xff] %vm972_vm5, %v880_v55  ;;  %237 = vrot.lane.b32.xlu0 %v139_v53, %s3197_s21  ;;  %2850 = vmatmul.mubr.msk.f32.gmra.mrb[16].mxu0 %vm1060_vm6, %v1019_v57 }
  0xc3   :  { %461 = vrot.lane.b32.xlu1 %v363_v56, %s3202_s27  ;;  %2852 = vmatprep.mubr.msk.f32.mxu0 %vm3200_vm0, %v3201_v5  ;;  %v593_v56 = vld [vmem:[%s4750_s0 + $0xf3] sm:$0xff] }
  0xc4   :  { %v210_v60 = vpop.permute.xlu0 %209 }
  0xc5   :  { %v434_v61 = vpop.permute.xlu1 %433  ;;  %311 = vst.msk [vmem:[#allocation2 + $0x50] sm:$0xff] %vm300_vm2, %v210_v60  ;;  %v71_v60 = vld [vmem:[%s4750_s0 + $0x100] sm:$0xff] }
  0xc6   :  { %535 = vst.msk [vmem:[#allocation2 + $0x50] sm:$0xff] %vm524_vm3, %v434_v61  ;;  %685 = vrot.lane.b32.xlu0 %v587_v58, %s3198_s22  ;;  %v146_v61 = vld [vmem:[%s4750_s0 + $0xf9] sm:$0xff] }
  0xc7   :  { %909 = vrot.lane.b32.xlu1 %v811_v62, %s3203_s28  ;;  %109 = vst.msk [vmem:[#allocation2 + $0x100] sm:$0xff] %vm76_vm1, %v71_v60  ;;  %vm1911_vm1 = vcmask 523520  }
  0xc8   :  { %v658_v0 = vpop.permute.xlu0 %657 }
  0xc9   :  { %v882_v1 = vpop.permute.xlu1 %881  ;;  %759 = vst.msk [vmem:[#allocation2 + $0x50] sm:$0xff] %vm748_vm4, %v658_v0  ;;  %v1020_v3 = vld [vmem:[#allocation2 + $0x48] sm:$0xff]  ;;  %v370_v0 = vld [vmem:[%s4750_s0 + $0xfa] sm:$0xff] }
  0xca   :  { %983 = vst.msk [vmem:[#allocation2 + $0x50] sm:$0xff] %vm972_vm5, %v882_v1  ;;  %239 = vrot.lane.b32.xlu0 %v140_v63, %s3197_s21  ;;  %2853 = vmatmul.mubr.msk.f32.gmra.mrb[18].mxu0 %vm1060_vm6, %v1020_v3 }
  0xcb   :  { %463 = vrot.lane.b32.xlu1 %v364_v2, %s3202_s27  ;;  %2855 = vmatprep.mubr.msk.f32.mxu0 %vm3200_vm0, %v3201_v5  ;;  %v594_v2 = vld [vmem:[%s4750_s0 + $0xfb] sm:$0xff] }
  0xcc   :  { %v212_v8 = vpop.permute.xlu0 %211 }
  0xcd   :  { %v436_v9 = vpop.permute.xlu1 %435  ;;  %312 = vst.msk [vmem:[#allocation2 + $0x58] sm:$0xff] %vm300_vm2, %v212_v8 }
  0xce   :  { %536 = vst.msk [vmem:[#allocation2 + $0x58] sm:$0xff] %vm524_vm3, %v436_v9  ;;  %687 = vrot.lane.b32.xlu0 %v588_v6, %s3198_s22  ;;  %v818_v6 = vld [vmem:[%s4750_s0 + $0xfc] sm:$0xff] }
  0xcf   :  { %911 = vrot.lane.b32.xlu1 %v812_v10, %s3203_s28  ;;  %v147_v9 = vld [vmem:[%s4750_s0 + $0x101] sm:$0xff] }
  0xd0   :  { %v660_v12 = vpop.permute.xlu0 %659 }
  0xd1   :  { %v884_v13 = vpop.permute.xlu1 %883  ;;  %760 = vst.msk [vmem:[#allocation2 + $0x58] sm:$0xff] %vm748_vm4, %v660_v12  ;;  %v1021_v15 = vld [vmem:[#allocation2 + $0x50] sm:$0xff] }
  0xd2   :  { %984 = vst.msk [vmem:[#allocation2 + $0x58] sm:$0xff] %vm972_vm5, %v884_v13  ;;  %241 = vrot.lane.b32.xlu0 %v141_v11, %s3197_s21  ;;  %2856 = vmatmul.mubr.msk.f32.gmra.mrb[20].mxu0 %vm1060_vm6, %v1021_v15  ;;  %v371_v11 = vld [vmem:[%s4750_s0 + $0x102] sm:$0xff] }
  0xd3   :  { %465 = vrot.lane.b32.xlu1 %v365_v14, %s3202_s27  ;;  %2858 = vmatprep.mubr.msk.f32.mxu0 %vm3200_vm0, %v3201_v5  ;;  %v595_v14 = vld [vmem:[%s4750_s0 + $0x103] sm:$0xff] }
  0xd4   :  { %v214_v18 = vpop.permute.xlu0 %213 }
  0xd5   :  { %v438_v19 = vpop.permute.xlu1 %437  ;;  %313 = vst.msk [vmem:[#allocation2 + $0x60] sm:$0xff] %vm300_vm2, %v214_v18 }
  0xd6   :  { %537 = vst.msk [vmem:[#allocation2 + $0x60] sm:$0xff] %vm524_vm3, %v438_v19  ;;  %689 = vrot.lane.b32.xlu0 %v589_v16, %s3198_s22  ;;  %v819_v16 = vld [vmem:[%s4750_s0 + $0x104] sm:$0xff] }
  0xd7   :  { %913 = vrot.lane.b32.xlu1 %v813_v20, %s3203_s28  ;;  %v148_v19 = vld [vmem:[%s4750_s0 + $0x109] sm:$0xff] }
  0xd8   :  { %v662_v22 = vpop.permute.xlu0 %661 }
  0xd9   :  { %v886_v23 = vpop.permute.xlu1 %885  ;;  %761 = vst.msk [vmem:[#allocation2 + $0x60] sm:$0xff] %vm748_vm4, %v662_v22  ;;  %v1022_v25 = vld [vmem:[#allocation2 + $0x58] sm:$0xff] }
  0xda   :  { %985 = vst.msk [vmem:[#allocation2 + $0x60] sm:$0xff] %vm972_vm5, %v886_v23  ;;  %243 = vrot.lane.b32.xlu0 %v142_v21, %s3197_s21  ;;  %2859 = vmatmul.mubr.msk.f32.gmra.mrb[22].mxu0 %vm1060_vm6, %v1022_v25  ;;  %v372_v21 = vld [vmem:[%s4750_s0 + $0x10a] sm:$0xff] }
  0xdb   :  { %467 = vrot.lane.b32.xlu1 %v366_v24, %s3202_s27  ;;  %2861 = vmatprep.mubr.msk.f32.mxu0 %vm3200_vm0, %v3201_v5  ;;  %v596_v24 = vld [vmem:[%s4750_s0 + $0x10b] sm:$0xff] }
  0xdc   :  { %v216_v28 = vpop.permute.xlu0 %215 }
  0xdd   :  { %v440_v29 = vpop.permute.xlu1 %439  ;;  %314 = vst.msk [vmem:[#allocation2 + $0x68] sm:$0xff] %vm300_vm2, %v216_v28 }
  0xde   :  { %538 = vst.msk [vmem:[#allocation2 + $0x68] sm:$0xff] %vm524_vm3, %v440_v29  ;;  %691 = vrot.lane.b32.xlu0 %v590_v26, %s3198_s22  ;;  %v820_v26 = vld [vmem:[%s4750_s0 + $0x10c] sm:$0xff] }
  0xdf   :  { %915 = vrot.lane.b32.xlu1 %v814_v30, %s3203_s28  ;;  %v149_v29 = vld [vmem:[%s4750_s0 + $0x111] sm:$0xff] }
  0xe0   :  { %v664_v32 = vpop.permute.xlu0 %663 }
  0xe1   :  { %v888_v33 = vpop.permute.xlu1 %887  ;;  %762 = vst.msk [vmem:[#allocation2 + $0x68] sm:$0xff] %vm748_vm4, %v664_v32  ;;  %v1023_v35 = vld [vmem:[#allocation2 + $0x60] sm:$0xff] }
  0xe2   :  { %986 = vst.msk [vmem:[#allocation2 + $0x68] sm:$0xff] %vm972_vm5, %v888_v33  ;;  %245 = vrot.lane.b32.xlu0 %v143_v31, %s3197_s21  ;;  %2862 = vmatmul.mubr.msk.f32.gmra.mrb[24].mxu0 %vm1060_vm6, %v1023_v35  ;;  %v373_v31 = vld [vmem:[%s4750_s0 + $0x112] sm:$0xff] }
  0xe3   :  { %469 = vrot.lane.b32.xlu1 %v367_v34, %s3202_s27  ;;  %2864 = vmatprep.mubr.msk.f32.mxu0 %vm3200_vm0, %v3201_v5  ;;  %v597_v34 = vld [vmem:[%s4750_s0 + $0x113] sm:$0xff] }
  0xe4   :  { %v218_v38 = vpop.permute.xlu0 %217 }
  0xe5   :  { %v442_v39 = vpop.permute.xlu1 %441  ;;  %315 = vst.msk [vmem:[#allocation2 + $0x70] sm:$0xff] %vm300_vm2, %v218_v38  ;;  %v150_v38 = vld [vmem:[%s4750_s0 + $0x119] sm:$0xff] }
  0xe6   :  { %539 = vst.msk [vmem:[#allocation2 + $0x70] sm:$0xff] %vm524_vm3, %v442_v39  ;;  %693 = vrot.lane.b32.xlu0 %v591_v36, %s3198_s22  ;;  %v821_v36 = vld [vmem:[%s4750_s0 + $0x114] sm:$0xff] }
  0xe7   :  { %917 = vrot.lane.b32.xlu1 %v815_v40, %s3203_s28  ;;  %v374_v40 = vld [vmem:[%s4750_s0 + $0x11a] sm:$0xff] }
  0xe8   :  { %v666_v42 = vpop.permute.xlu0 %665 }
  0xe9   :  { %v890_v43 = vpop.permute.xlu1 %889  ;;  %763 = vst.msk [vmem:[#allocation2 + $0x70] sm:$0xff] %vm748_vm4, %v666_v42  ;;  %v1024_v45 = vld [vmem:[#allocation2 + $0x68] sm:$0xff] }
  0xea   :  { %987 = vst.msk [vmem:[#allocation2 + $0x70] sm:$0xff] %vm972_vm5, %v890_v43  ;;  %247 = vrot.lane.b32.xlu0 %v144_v41, %s3197_s21  ;;  %2865 = vmatmul.mubr.msk.f32.gmra.mrb[26].mxu0 %vm1060_vm6, %v1024_v45  ;;  %v598_v43 = vld [vmem:[%s4750_s0 + $0x11b] sm:$0xff] }
  0xeb   :  { %471 = vrot.lane.b32.xlu1 %v368_v44, %s3202_s27  ;;  %2867 = vmatprep.mubr.msk.f32.mxu0 %vm3200_vm0, %v3201_v5  ;;  %v822_v45 = vld [vmem:[%s4750_s0 + $0x11c] sm:$0xff] }
  0xec   :  { %v220_v48 = vpop.permute.xlu0 %219 }
  0xed   :  { %v444_v49 = vpop.permute.xlu1 %443  ;;  %316 = vst.msk [vmem:[#allocation2 + $0x78] sm:$0xff] %vm300_vm2, %v220_v48 }
  0xee   :  { %540 = vst.msk [vmem:[#allocation2 + $0x78] sm:$0xff] %vm524_vm3, %v444_v49  ;;  %695 = vrot.lane.b32.xlu0 %v592_v46, %s3198_s22  ;;  %v375_v49 = vld [vmem:[%s4750_s0 + $0x122] sm:$0xf] }
  0xef   :  { %919 = vrot.lane.b32.xlu1 %v816_v50, %s3203_s28 }
  0xf0   :  { %v668_v52 = vpop.permute.xlu0 %667 }
  0xf1   :  { %v892_v53 = vpop.permute.xlu1 %891  ;;  %764 = vst.msk [vmem:[#allocation2 + $0x78] sm:$0xff] %vm748_vm4, %v668_v52  ;;  %v1025_v55 = vld [vmem:[#allocation2 + $0x70] sm:$0xff]  ;;  %v75_v52 = vld [vmem:[%s4750_s0 + $0x120] sm:$0xf] }
  0xf2   :  { %988 = vst.msk [vmem:[#allocation2 + $0x78] sm:$0xff] %vm972_vm5, %v892_v53  ;;  %249 = vrot.lane.b32.xlu0 %v145_v51, %s3197_s21  ;;  %2868 = vmatmul.mubr.msk.f32.gmra.mrb[28].mxu0 %vm1060_vm6, %v1025_v55  ;;  %v599_v53 = vld [vmem:[%s4750_s0 + $0x123] sm:$0xf] }
  0xf3   :  { %473 = vrot.lane.b32.xlu1 %v369_v54, %s3202_s27  ;;  %2870 = vmatprep.mubr.msk.f32.mxu0 %vm3200_vm0, %v3201_v5  ;;  %114 = vst.msk [vmem:[#allocation2 + $0x120] sm:$0xf] %vm113_vm7, %v75_v52  ;;  %v823_v55 = vld [vmem:[%s4750_s0 + $0x124] sm:$0xf]  ;;  %vm2195_vm7 = vcmask 424960  }
  0xf4   :  { %v222_v57 = vpop.permute.xlu0 %221 }
  0xf5   :  { %v446_v58 = vpop.permute.xlu1 %445  ;;  %317 = vst.msk [vmem:[#allocation2 + $0x80] sm:$0xff] %vm300_vm2, %v222_v57 }
  0xf6   :  { %541 = vst.msk [vmem:[#allocation2 + $0x80] sm:$0xff] %vm524_vm3, %v446_v58  ;;  %697 = vrot.lane.b32.xlu0 %v593_v56, %s3198_s22 }
  0xf7   :  { %921 = vrot.lane.b32.xlu1 %v817_v59, %s3203_s28 }
  0xf8   :  { %v670_v62 = vpop.permute.xlu0 %669 }
  0xf9   :  { %v894_v63 = vpop.permute.xlu1 %893  ;;  %765 = vst.msk [vmem:[#allocation2 + $0x80] sm:$0xff] %vm748_vm4, %v670_v62  ;;  %v1026_v1 = vld [vmem:[#allocation2 + $0x78] sm:$0xff] }
  0xfa   :  { %989 = vst.msk [vmem:[#allocation2 + $0x80] sm:$0xff] %vm972_vm5, %v894_v63  ;;  %251 = vrot.lane.b32.xlu0 %v146_v61, %s3197_s21  ;;  %2871 = vmatmul.mubr.msk.f32.gmra.mrb[30].mxu0 %vm1060_vm6, %v1026_v1 }
  0xfb   :  { %475 = vrot.lane.b32.xlu1 %v370_v0, %s3202_s27  ;;  %2873 = vmatprep.mubr.msk.f32.mxu0 %vm3200_vm0, %v3201_v5 }
  0xfc   :  { %v224_v3 = vpop.permute.xlu0 %223 }
  0xfd   :  { %318 = vst.msk [vmem:[#allocation2 + $0x88] sm:$0xff] %vm300_vm2, %v224_v3  ;;  %v448_v8 = vpop.permute.xlu1 %447 }
  0xfe   :  { %542 = vst.msk [vmem:[#allocation2 + $0x88] sm:$0xff] %vm524_vm3, %v448_v8  ;;  %699 = vrot.lane.b32.xlu0 %v594_v2, %s3198_s22 }
  0xff   :  { %923 = vrot.lane.b32.xlu1 %v818_v6, %s3203_s28 }
 0x100   :  { %v672_v10 = vpop.permute.xlu0 %671 }
 0x101   :  { %766 = vst.msk [vmem:[#allocation2 + $0x88] sm:$0xff] %vm748_vm4, %v672_v10  ;;  %v896_v12 = vpop.permute.xlu1 %895  ;;  %v1027_v13 = vld [vmem:[#allocation2 + $0x80] sm:$0xff] }
 0x102   :  { %990 = vst.msk [vmem:[#allocation2 + $0x88] sm:$0xff] %vm972_vm5, %v896_v12  ;;  %253 = vrot.lane.b32.xlu0 %v147_v9, %s3197_s21  ;;  %2874 = vmatmul.mubr.msk.f32.gmra.mrb[32].mxu0 %vm1060_vm6, %v1027_v13 }
 0x103   :  { %477 = vrot.lane.b32.xlu1 %v371_v11, %s3202_s27  ;;  %2876 = vmatprep.mubr.msk.f32.mxu0 %vm3200_vm0, %v3201_v5 }
 0x104   :  { %v226_v15 = vpop.permute.xlu0 %225 }
 0x105   :  { %319 = vst.msk [vmem:[#allocation2 + $0x90] sm:$0xff] %vm300_vm2, %v226_v15  ;;  %v450_v18 = vpop.permute.xlu1 %449 }
 0x106   :  { %543 = vst.msk [vmem:[#allocation2 + $0x90] sm:$0xff] %vm524_vm3, %v450_v18  ;;  %701 = vrot.lane.b32.xlu0 %v595_v14, %s3198_s22 }
 0x107   :  { %925 = vrot.lane.b32.xlu1 %v819_v16, %s3203_s28 }
 0x108   :  { %v674_v20 = vpop.permute.xlu0 %673 }
 0x109   :  { %767 = vst.msk [vmem:[#allocation2 + $0x90] sm:$0xff] %vm748_vm4, %v674_v20  ;;  %v898_v22 = vpop.permute.xlu1 %897  ;;  %v1028_v23 = vld [vmem:[#allocation2 + $0x88] sm:$0xff] }
 0x10a   :  { %991 = vst.msk [vmem:[#allocation2 + $0x90] sm:$0xff] %vm972_vm5, %v898_v22  ;;  %255 = vrot.lane.b32.xlu0 %v148_v19, %s3197_s21  ;;  %2877 = vmatmul.mubr.msk.f32.gmra.mrb[34].mxu0 %vm1060_vm6, %v1028_v23 }
 0x10b   :  { %479 = vrot.lane.b32.xlu1 %v372_v21, %s3202_s27  ;;  %2879 = vmatprep.mubr.msk.f32.mxu0 %vm3200_vm0, %v3201_v5 }
 0x10c   :  { %v228_v25 = vpop.permute.xlu0 %227 }
 0x10d   :  { %320 = vst.msk [vmem:[#allocation2 + $0x98] sm:$0xff] %vm300_vm2, %v228_v25  ;;  %v452_v28 = vpop.permute.xlu1 %451 }
 0x10e   :  { %544 = vst.msk [vmem:[#allocation2 + $0x98] sm:$0xff] %vm524_vm3, %v452_v28  ;;  %703 = vrot.lane.b32.xlu0 %v596_v24, %s3198_s22  ;;  %v4224_v28 = vld [vmem:[%s4752_s2] ss:$0 sm:$0xff] }
 0x10f   :  { %927 = vrot.lane.b32.xlu1 %v820_v26, %s3203_s28 }
 0x110   :  { %v676_v30 = vpop.permute.xlu0 %675 }
 0x111   :  { %768 = vst.msk [vmem:[#allocation2 + $0x98] sm:$0xff] %vm748_vm4, %v676_v30  ;;  %v900_v32 = vpop.permute.xlu1 %899  ;;  %v1029_v33 = vld [vmem:[#allocation2 + $0x90] sm:$0xff] }
 0x112   :  { %992 = vst.msk [vmem:[#allocation2 + $0x98] sm:$0xff] %vm972_vm5, %v900_v32  ;;  %257 = vrot.lane.b32.xlu0 %v149_v29, %s3197_s21  ;;  %2880 = vmatmul.mubr.msk.f32.gmra.mrb[36].mxu0 %vm1060_vm6, %v1029_v33 }
 0x113   :  { %481 = vrot.lane.b32.xlu1 %v373_v31, %s3202_s27  ;;  %2882 = vmatprep.mubr.msk.f32.mxu0 %vm3200_vm0, %v3201_v5 }
 0x114   :  { %v230_v35 = vpop.permute.xlu0 %229 }
 0x115   :  { %321 = vst.msk [vmem:[#allocation2 + $0xa0] sm:$0xff] %vm300_vm2, %v230_v35  ;;  %v454_v37 = vpop.permute.xlu1 %453 }
 0x116   :  { %545 = vst.msk [vmem:[#allocation2 + $0xa0] sm:$0xff] %vm524_vm3, %v454_v37  ;;  %705 = vrot.lane.b32.xlu0 %v597_v34, %s3198_s22 }
 0x117   :  { %929 = vrot.lane.b32.xlu1 %v821_v36, %s3203_s28 }
 0x118   :  { %v678_v39 = vpop.permute.xlu0 %677 }
 0x119   :  { %769 = vst.msk [vmem:[#allocation2 + $0xa0] sm:$0xff] %vm748_vm4, %v678_v39  ;;  %v902_v41 = vpop.permute.xlu1 %901  ;;  %v1030_v42 = vld [vmem:[#allocation2 + $0x98] sm:$0xff] }
 0x11a   :  { %993 = vst.msk [vmem:[#allocation2 + $0xa0] sm:$0xff] %vm972_vm5, %v902_v41  ;;  %259 = vrot.lane.b32.xlu0 %v150_v38, %s3197_s21  ;;  %2883 = vmatmul.mubr.msk.f32.gmra.mrb[38].mxu0 %vm1060_vm6, %v1030_v42 }
 0x11b   :  { %483 = vrot.lane.b32.xlu1 %v374_v40, %s3202_s27  ;;  %2885 = vmatprep.mubr.msk.f32.mxu0 %vm3200_vm0, %v3201_v5 }
 0x11c   :  { %v232_v44 = vpop.permute.xlu0 %231 }
 0x11d   :  { %322 = vst.msk [vmem:[#allocation2 + $0xa8] sm:$0xff] %vm300_vm2, %v232_v44  ;;  %v456_v46 = vpop.permute.xlu1 %455 }
 0x11e   :  { %546 = vst.msk [vmem:[#allocation2 + $0xa8] sm:$0xff] %vm524_vm3, %v456_v46  ;;  %707 = vrot.lane.b32.xlu0 %v598_v43, %s3198_s22 }
 0x11f   :  { %931 = vrot.lane.b32.xlu1 %v822_v45, %s3203_s28 }
 0x120   :  { %v680_v48 = vpop.permute.xlu0 %679 }
 0x121   :  { %770 = vst.msk [vmem:[#allocation2 + $0xa8] sm:$0xff] %vm748_vm4, %v680_v48  ;;  %v904_v50 = vpop.permute.xlu1 %903  ;;  %v1031_v51 = vld [vmem:[#allocation2 + $0xa0] sm:$0xff] }
 0x122   :  { %994 = vst.msk [vmem:[#allocation2 + $0xa8] sm:$0xff] %vm972_vm5, %v904_v50  ;;  %2886 = vmatmul.mubr.msk.f32.gmra.mrb[40].mxu0 %vm1060_vm6, %v1031_v51  ;;  %261 = vrot.lane.b32.xlu0 %v151_v47, %s3197_s21 }
 0x123   :  { %2888 = vmatprep.mubr.msk.f32.mxu0 %vm3200_vm0, %v3201_v5  ;;  %485 = vrot.lane.b32.xlu1 %v375_v49, %s3202_s27 }
 0x124   :  { %v234_v54 = vpop.permute.xlu0 %233 }
 0x125   :  { %323 = vst.msk [vmem:[#allocation2 + $0xb0] sm:$0xff] %vm300_vm2, %v234_v54  ;;  %v458_v56 = vpop.permute.xlu1 %457 }
 0x126   :  { %547 = vst.msk [vmem:[#allocation2 + $0xb0] sm:$0xff] %vm524_vm3, %v458_v56  ;;  %709 = vrot.lane.b32.xlu0 %v599_v53, %s3198_s22 }
 0x127   :  { %933 = vrot.lane.b32.xlu1 %v823_v55, %s3203_s28 }
 0x128   :  { %v682_v57 = vpop.permute.xlu0 %681 }
 0x129   :  { %771 = vst.msk [vmem:[#allocation2 + $0xb0] sm:$0xff] %vm748_vm4, %v682_v57  ;;  %v906_v58 = vpop.permute.xlu1 %905  ;;  %v1032_v59 = vld [vmem:[#allocation2 + $0xa8] sm:$0xff] }
 0x12a   :  { %995 = vst.msk [vmem:[#allocation2 + $0xb0] sm:$0xff] %vm972_vm5, %v906_v58  ;;  %2889 = vmatmul.mubr.msk.f32.gmra.mrb[42].mxu0 %vm1060_vm6, %v1032_v59 }
 0x12b   :  { %2891 = vmatprep.mubr.msk.f32.mxu0 %vm3200_vm0, %v3201_v5 }
 0x12c   :  { %v236_v60 = vpop.permute.xlu0 %235 }
 0x12d   :  { %324 = vst.msk [vmem:[#allocation2 + $0xb8] sm:$0xff] %vm300_vm2, %v236_v60  ;;  %v460_v61 = vpop.permute.xlu1 %459 }
 0x12e   :  { %548 = vst.msk [vmem:[#allocation2 + $0xb8] sm:$0xff] %vm524_vm3, %v460_v61 }
 0x130   :  { %v684_v62 = vpop.permute.xlu0 %683 }
 0x131   :  { %772 = vst.msk [vmem:[#allocation2 + $0xb8] sm:$0xff] %vm748_vm4, %v684_v62  ;;  %v908_v63 = vpop.permute.xlu1 %907  ;;  %v1033_v0 = vld [vmem:[#allocation2 + $0xb0] sm:$0xff] }
 0x132   :  { %996 = vst.msk [vmem:[#allocation2 + $0xb8] sm:$0xff] %vm972_vm5, %v908_v63  ;;  %2892 = vmatmul.mubr.msk.f32.gmra.mrb[44].mxu0 %vm1060_vm6, %v1033_v0 }
 0x133   :  { %2894 = vmatprep.mubr.msk.f32.mxu0 %vm3200_vm0, %v3201_v5 }
 0x134   :  { %v238_v1 = vpop.permute.xlu0 %237 }
 0x135   :  { %325 = vst.msk [vmem:[#allocation2 + $0xc0] sm:$0xff] %vm300_vm2, %v238_v1  ;;  %v462_v2 = vpop.permute.xlu1 %461 }
 0x136   :  { %549 = vst.msk [vmem:[#allocation2 + $0xc0] sm:$0xff] %vm524_vm3, %v462_v2 }
 0x138   :  { %v686_v3 = vpop.permute.xlu0 %685 }
 0x139   :  { %773 = vst.msk [vmem:[#allocation2 + $0xc0] sm:$0xff] %vm748_vm4, %v686_v3  ;;  %v910_v6 = vpop.permute.xlu1 %909  ;;  %v1034_v7 = vld [vmem:[#allocation2 + $0xb8] sm:$0xff] }
 0x13a   :  { %997 = vst.msk [vmem:[#allocation2 + $0xc0] sm:$0xff] %vm972_vm5, %v910_v6  ;;  %2895 = vmatmul.mubr.msk.f32.gmra.mrb[46].mxu0 %vm1060_vm6, %v1034_v7 }
 0x13b   :  { %2897 = vmatprep.mubr.msk.f32.mxu0 %vm3200_vm0, %v3201_v5 }
 0x13c   :  { %v240_v8 = vpop.permute.xlu0 %239 }
 0x13d   :  { %326 = vst.msk [vmem:[#allocation2 + $0xc8] sm:$0xff] %vm300_vm2, %v240_v8  ;;  %v464_v9 = vpop.permute.xlu1 %463 }
 0x13e   :  { %550 = vst.msk [vmem:[#allocation2 + $0xc8] sm:$0xff] %vm524_vm3, %v464_v9 }
 0x140   :  { %v688_v10 = vpop.permute.xlu0 %687 }
 0x141   :  { %774 = vst.msk [vmem:[#allocation2 + $0xc8] sm:$0xff] %vm748_vm4, %v688_v10  ;;  %v912_v11 = vpop.permute.xlu1 %911  ;;  %v1035_v12 = vld [vmem:[#allocation2 + $0xc0] sm:$0xff] }
 0x142   :  { %998 = vst.msk [vmem:[#allocation2 + $0xc8] sm:$0xff] %vm972_vm5, %v912_v11  ;;  %2898 = vmatmul.mubr.msk.f32.gmra.mrb[48].mxu0 %vm1060_vm6, %v1035_v12 }
 0x143   :  { %2900 = vmatprep.mubr.msk.f32.mxu0 %vm3200_vm0, %v3201_v5 }
 0x144   :  { %v242_v13 = vpop.permute.xlu0 %241 }
 0x145   :  { %327 = vst.msk [vmem:[#allocation2 + $0xd0] sm:$0xff] %vm300_vm2, %v242_v13  ;;  %v466_v14 = vpop.permute.xlu1 %465 }
 0x146   :  { %551 = vst.msk [vmem:[#allocation2 + $0xd0] sm:$0xff] %vm524_vm3, %v466_v14 }
 0x148   :  { %v690_v15 = vpop.permute.xlu0 %689 }
 0x149   :  { %775 = vst.msk [vmem:[#allocation2 + $0xd0] sm:$0xff] %vm748_vm4, %v690_v15  ;;  %v914_v16 = vpop.permute.xlu1 %913  ;;  %v1036_v17 = vld [vmem:[#allocation2 + $0xc8] sm:$0xff] }
 0x14a   :  { %999 = vst.msk [vmem:[#allocation2 + $0xd0] sm:$0xff] %vm972_vm5, %v914_v16  ;;  %2901 = vmatmul.mubr.msk.f32.gmra.mrb[50].mxu0 %vm1060_vm6, %v1036_v17 }
 0x14b   :  { %2903 = vmatprep.mubr.msk.f32.mxu0 %vm3200_vm0, %v3201_v5 }
 0x14c   :  { %v244_v18 = vpop.permute.xlu0 %243 }
 0x14d   :  { %328 = vst.msk [vmem:[#allocation2 + $0xd8] sm:$0xff] %vm300_vm2, %v244_v18  ;;  %v468_v19 = vpop.permute.xlu1 %467 }
 0x14e   :  { %552 = vst.msk [vmem:[#allocation2 + $0xd8] sm:$0xff] %vm524_vm3, %v468_v19 }
 0x150   :  { %v692_v20 = vpop.permute.xlu0 %691 }
 0x151   :  { %776 = vst.msk [vmem:[#allocation2 + $0xd8] sm:$0xff] %vm748_vm4, %v692_v20  ;;  %v916_v21 = vpop.permute.xlu1 %915  ;;  %v1037_v22 = vld [vmem:[#allocation2 + $0xd0] sm:$0xff] }
 0x152   :  { %1000 = vst.msk [vmem:[#allocation2 + $0xd8] sm:$0xff] %vm972_vm5, %v916_v21  ;;  %2904 = vmatmul.mubr.msk.f32.gmra.mrb[52].mxu0 %vm1060_vm6, %v1037_v22 }
 0x153   :  { %2906 = vmatprep.mubr.msk.f32.mxu0 %vm3200_vm0, %v3201_v5 }
 0x154   :  { %v246_v23 = vpop.permute.xlu0 %245 }
 0x155   :  { %329 = vst.msk [vmem:[#allocation2 + $0xe0] sm:$0xff] %vm300_vm2, %v246_v23  ;;  %v470_v24 = vpop.permute.xlu1 %469 }
 0x156   :  { %553 = vst.msk [vmem:[#allocation2 + $0xe0] sm:$0xff] %vm524_vm3, %v470_v24  ;;  %v1238_v25 = vpop.f32.mrb[0].mxu0 }
 0x157   :  { %v2827_v26 = vpop.f32.mrb[1].mxu0  ;;  %v1239_v31 = vadd.f32 %v4224_v28, %v1238_v25 }
 0x158   :  { %v694_v27 = vpop.permute.xlu0 %693 }
 0x159   :  { %777 = vst.msk [vmem:[#allocation2 + $0xe0] sm:$0xff] %vm748_vm4, %v694_v27  ;;  %v918_v29 = vpop.permute.xlu1 %917  ;;  %v1038_v30 = vld [vmem:[#allocation2 + $0xd8] sm:$0xff]  ;;  %v1422_v37 = vmax.f32 %v1239_v31, 0.0 }
 0x15a   :  { %1001 = vst.msk [vmem:[#allocation2 + $0xe0] sm:$0xff] %vm972_vm5, %v918_v29  ;;  %2907 = vmatmul.mubr.msk.f32.gmra.mrb[54].mxu0 %vm1060_vm6, %v1038_v30 }
 0x15b   :  { %2909 = vmatprep.mubr.msk.f32.mxu0 %vm3200_vm0, %v3201_v5 }
 0x15c   :  { %v248_v32 = vpop.permute.xlu0 %247 }
 0x15d   :  { %330 = vst.msk [vmem:[#allocation2 + $0xe8] sm:$0xff] %vm300_vm2, %v248_v32  ;;  %v472_v33 = vpop.permute.xlu1 %471  ;;  %v1243_v34 = vpop.f32.mrb[2].mxu0 }
 0x15e   :  { %554 = vst.msk [vmem:[#allocation2 + $0xe8] sm:$0xff] %vm524_vm3, %v472_v33  ;;  %v1244_v35 = vadd.f32 %v4224_v28, %v1243_v34  ;;  %v2830_v36 = vpop.f32.mrb[3].mxu0 }
 0x160   :  { %v1423_v38 = vmax.f32 %v1244_v35, 0.0  ;;  %v696_v39 = vpop.permute.xlu0 %695 }
 0x161   :  { %778 = vst.msk [vmem:[#allocation2 + $0xe8] sm:$0xff] %vm748_vm4, %v696_v39  ;;  %v920_v40 = vpop.permute.xlu1 %919  ;;  %v1039_v41 = vld [vmem:[#allocation2 + $0xe0] sm:$0xff] }
 0x162   :  { %1002 = vst.msk [vmem:[#allocation2 + $0xe8] sm:$0xff] %vm972_vm5, %v920_v40  ;;  %2910 = vmatmul.mubr.msk.f32.gmra.mrb[56].mxu0 %vm1060_vm6, %v1039_v41  ;;  %v4238_v42 = vpack.c.bf16 %v1423_v38, %v1422_v37 }
 0x163   :  { %2912 = vmatprep.mubr.msk.f32.mxu0 %vm3200_vm0, %v3201_v5 }
 0x164   :  { %v250_v43 = vpop.permute.xlu0 %249 }
 0x165   :  { %331 = vst.msk [vmem:[#allocation2 + $0xf0] sm:$0xff] %vm300_vm2, %v250_v43  ;;  %v474_v44 = vpop.permute.xlu1 %473  ;;  %v1248_v45 = vpop.f32.mrb[4].mxu0 }
 0x166   :  { %555 = vst.msk [vmem:[#allocation2 + $0xf0] sm:$0xff] %vm524_vm3, %v474_v44  ;;  %v2833_v46 = vpop.f32.mrb[5].mxu0  ;;  %v1249_v50 = vadd.f32 %v4224_v28, %v1248_v45 }
 0x168   :  { %v698_v47 = vpop.permute.xlu0 %697  ;;  %v1424_v56 = vmax.f32 %v1249_v50, 0.0 }
 0x169   :  { %779 = vst.msk [vmem:[#allocation2 + $0xf0] sm:$0xff] %vm748_vm4, %v698_v47  ;;  %v922_v48 = vpop.permute.xlu1 %921  ;;  %v1040_v49 = vld [vmem:[#allocation2 + $0xe8] sm:$0xff] }
 0x16a   :  { %1003 = vst.msk [vmem:[#allocation2 + $0xf0] sm:$0xff] %vm972_vm5, %v922_v48  ;;  %2913 = vmatmul.mubr.msk.f32.gmra.mrb[58].mxu0 %vm1060_vm6, %v1040_v49 }
 0x16b   :  { %2915 = vmatprep.mubr.msk.f32.mxu0 %vm3200_vm0, %v3201_v5 }
 0x16c   :  { %v252_v51 = vpop.permute.xlu0 %251 }
 0x16d   :  { %332 = vst.msk [vmem:[#allocation2 + $0xf8] sm:$0xff] %vm300_vm2, %v252_v51  ;;  %v476_v52 = vpop.permute.xlu1 %475  ;;  %v1253_v53 = vpop.f32.mrb[6].mxu0 }
 0x16e   :  { %556 = vst.msk [vmem:[#allocation2 + $0xf8] sm:$0xff] %vm524_vm3, %v476_v52  ;;  %v1254_v54 = vadd.f32 %v4224_v28, %v1253_v53  ;;  %v2836_v55 = vpop.f32.mrb[7].mxu0 }
 0x170   :  { %v1425_v57 = vmax.f32 %v1254_v54, 0.0  ;;  %v700_v58 = vpop.permute.xlu0 %699 }
 0x171   :  { %780 = vst.msk [vmem:[#allocation2 + $0xf8] sm:$0xff] %vm748_vm4, %v700_v58  ;;  %v924_v59 = vpop.permute.xlu1 %923  ;;  %v1041_v60 = vld [vmem:[#allocation2 + $0xf0] sm:$0xff] }
 0x172   :  { %v4254_v61 = vpack.c.bf16 %v1425_v57, %v1424_v56  ;;  %1004 = vst.msk [vmem:[#allocation2 + $0xf8] sm:$0xff] %vm972_vm5, %v924_v59  ;;  %2916 = vmatmul.mubr.msk.f32.gmra.mrb[60].mxu0 %vm1060_vm6, %v1041_v60 }
 0x173   :  { %2918 = vmatprep.mubr.msk.f32.mxu0 %vm3200_vm0, %v3201_v5 }
 0x174   :  { %v254_v62 = vpop.permute.xlu0 %253 }
 0x175   :  { %333 = vst.msk [vmem:[#allocation2 + $0x100] sm:$0xff] %vm300_vm2, %v254_v62  ;;  %v478_v63 = vpop.permute.xlu1 %477  ;;  %v1258_v0 = vpop.f32.mrb[8].mxu0 }
 0x176   :  { %557 = vst.msk [vmem:[#allocation2 + $0x100] sm:$0xff] %vm524_vm3, %v478_v63  ;;  %v2839_v1 = vpop.f32.mrb[9].mxu0  ;;  %v1259_v7 = vadd.f32 %v4224_v28, %v1258_v0 }
 0x178   :  { %v702_v2 = vpop.permute.xlu0 %701  ;;  %v1426_v13 = vmax.f32 %v1259_v7, 0.0 }
 0x179   :  { %781 = vst.msk [vmem:[#allocation2 + $0x100] sm:$0xff] %vm748_vm4, %v702_v2  ;;  %v926_v3 = vpop.permute.xlu1 %925  ;;  %v1042_v6 = vld [vmem:[#allocation2 + $0xf8] sm:$0xff] }
 0x17a   :  { %1005 = vst.msk [vmem:[#allocation2 + $0x100] sm:$0xff] %vm972_vm5, %v926_v3  ;;  %2919 = vmatmul.mubr.msk.f32.gmra.mrb[62].mxu0 %vm1060_vm6, %v1042_v6 }
 0x17b   :  { %2921 = vmatprep.mubr.msk.f32.mxu0 %vm3200_vm0, %v3201_v5 }
 0x17c   :  { %v256_v8 = vpop.permute.xlu0 %255 }
 0x17d   :  { %334 = vst.msk [vmem:[#allocation2 + $0x108] sm:$0xff] %vm300_vm2, %v256_v8  ;;  %v480_v9 = vpop.permute.xlu1 %479  ;;  %v1263_v10 = vpop.f32.mrb[10].mxu0 }
 0x17e   :  { %558 = vst.msk [vmem:[#allocation2 + $0x108] sm:$0xff] %vm524_vm3, %v480_v9  ;;  %v1264_v11 = vadd.f32 %v4224_v28, %v1263_v10  ;;  %v2842_v12 = vpop.f32.mrb[11].mxu0 }
 0x180   :  { %v1427_v14 = vmax.f32 %v1264_v11, 0.0  ;;  %v704_v15 = vpop.permute.xlu0 %703 }
 0x181   :  { %782 = vst.msk [vmem:[#allocation2 + $0x108] sm:$0xff] %vm748_vm4, %v704_v15  ;;  %v928_v16 = vpop.permute.xlu1 %927  ;;  %v1043_v17 = vld [vmem:[#allocation2 + $0x100] sm:$0xff] }
 0x182   :  { %v4272_v18 = vpack.c.bf16 %v1427_v14, %v1426_v13  ;;  %1006 = vst.msk [vmem:[#allocation2 + $0x108] sm:$0xff] %vm972_vm5, %v928_v16  ;;  %2922 = vmatmul.mubr.msk.f32.gmra.mrb[64].mxu0 %vm1060_vm6, %v1043_v17 }
 0x183   :  { %2924 = vmatprep.mubr.msk.f32.mxu0 %vm3200_vm0, %v3201_v5 }
 0x184   :  { %v258_v19 = vpop.permute.xlu0 %257 }
 0x185   :  { %335 = vst.msk [vmem:[#allocation2 + $0x110] sm:$0xff] %vm300_vm2, %v258_v19  ;;  %v482_v20 = vpop.permute.xlu1 %481  ;;  %v1268_v21 = vpop.f32.mrb[12].mxu0 }
 0x186   :  { %559 = vst.msk [vmem:[#allocation2 + $0x110] sm:$0xff] %vm524_vm3, %v482_v20  ;;  %v2845_v22 = vpop.f32.mrb[13].mxu0  ;;  %v1269_v26 = vadd.f32 %v4224_v28, %v1268_v21 }
 0x187   :  { %v4319_v22 = vld [vmem:[%s4753_s3] sm:$0xff] }
 0x188   :  { %v706_v23 = vpop.permute.xlu0 %705  ;;  %v1428_v33 = vmax.f32 %v1269_v26, 0.0 }
 0x189   :  { %783 = vst.msk [vmem:[#allocation2 + $0x110] sm:$0xff] %vm748_vm4, %v706_v23  ;;  %v930_v24 = vpop.permute.xlu1 %929  ;;  %v1044_v25 = vld [vmem:[#allocation2 + $0x108] sm:$0xff] }
 0x18a   :  { %1007 = vst.msk [vmem:[#allocation2 + $0x110] sm:$0xff] %vm972_vm5, %v930_v24  ;;  %2925 = vmatmul.mubr.msk.f32.gmra.mrb[66].mxu0 %vm1060_vm6, %v1044_v25  ;;  %v1488_v24 = vunpack.c.h.bf16 %v4319_v22 }
 0x18b   :  { %2927 = vmatprep.mubr.msk.f32.mxu0 %vm3200_vm0, %v3201_v5 }
 0x18c   :  { %v260_v27 = vpop.permute.xlu0 %259  ;;  %1640 = vmatprep.mubr.f32.mxu1 %v1488_v24 }
 0x18d   :  { %336 = vst.msk [vmem:[#allocation2 + $0x118] sm:$0xff] %vm300_vm2, %v260_v27  ;;  %v484_v29 = vpop.permute.xlu1 %483  ;;  %v1273_v30 = vpop.f32.mrb[14].mxu0  ;;  %vm1955_vm2 = vcmask 785920  }
 0x18e   :  { %560 = vst.msk [vmem:[#allocation2 + $0x118] sm:$0xff] %vm524_vm3, %v484_v29  ;;  %v1274_v31 = vadd.f32 %v4224_v28, %v1273_v30  ;;  %v2848_v32 = vpop.f32.mrb[15].mxu0  ;;  %vm1999_vm3 = vcmask 1048320  }
 0x190   :  { %v1429_v34 = vmax.f32 %v1274_v31, 0.0  ;;  %v708_v35 = vpop.permute.xlu0 %707 }
 0x191   :  { %784 = vst.msk [vmem:[#allocation2 + $0x118] sm:$0xff] %vm748_vm4, %v708_v35  ;;  %v932_v36 = vpop.permute.xlu1 %931  ;;  %v1045_v37 = vld [vmem:[#allocation2 + $0x110] sm:$0xff]  ;;  %vm1918_vm4 = vcmask 519424  }
 0x192   :  { %v4290_v38 = vpack.c.bf16 %v1429_v34, %v1428_v33  ;;  %1008 = vst.msk [vmem:[#allocation2 + $0x118] sm:$0xff] %vm972_vm5, %v932_v36  ;;  %2928 = vmatmul.mubr.msk.f32.gmra.mrb[68].mxu0 %vm1060_vm6, %v1045_v37  ;;  %vm1962_vm5 = vcmask 781824  }
 0x193   :  { %2930 = vmatprep.mubr.msk.f32.mxu0 %vm3200_vm0, %v3201_v5 }
 0x194   :  { %v262_v39 = vpop.permute.xlu0 %261 }
 0x195   :  { %v1278_v40 = vpop.f32.mrb[16].mxu0  ;;  %338 = vst.msk [vmem:[#allocation2 + $0x120] sm:$0xf] %vm337_vm8, %v262_v39  ;;  %v486_v41 = vpop.permute.xlu1 %485  ;;  %vm2284_vm8 = vcmask 517120  }
 0x196   :  { %v2851_v43 = vpop.f32.mrb[17].mxu0  ;;  %562 = vst.msk [vmem:[#allocation2 + $0x120] sm:$0xf] %vm561_vm9, %v486_v41  ;;  %v1279_v47 = vadd.f32 %v4224_v28, %v1278_v40  ;;  %vm2298_vm9 = vcmask 1041920  }
 0x198   :  { %v710_v44 = vpop.permute.xlu0 %709  ;;  %v1430_v51 = vmax.f32 %v1279_v47, 0.0 }
 0x199   :  { %v1046_v45 = vld [vmem:[#allocation2 + $0x118] sm:$0xff]  ;;  %786 = vst.msk [vmem:[#allocation2 + $0x120] sm:$0xf] %vm785_vm10, %v710_v44  ;;  %v934_v46 = vpop.permute.xlu1 %933  ;;  %vm2530_vm10 = vcmask 9216  }
 0x19a   :  { %2931 = vmatmul.mubr.msk.f32.gmra.mrb[70].mxu0 %vm1060_vm6, %v1046_v45  ;;  %1010 = vst.msk [vmem:[#allocation2 + $0x120] sm:$0xf] %vm1009_vm11, %v934_v46 }
 0x19b   :  { %2933 = vmatprep.mubr.msk.f32.mxu0 %vm3200_vm0, %v3201_v5 }
 0x19d   :  { %v1283_v48 = vpop.f32.mrb[18].mxu0 }
 0x19e   :  { %v1284_v49 = vadd.f32 %v4224_v28, %v1283_v48  ;;  %v2854_v50 = vpop.f32.mrb[19].mxu0 }
 0x1a0   :  { %v1431_v52 = vmax.f32 %v1284_v49, 0.0 }
 0x1a1   :  { %v1047_v53 = vld [vmem:[#allocation2 + $0x120] sm:$0xf] }
 0x1a2   :  { %v4301_v54 = vpack.c.bf16 %v1431_v52, %v1430_v51  ;;  %2934 = vmatmul.mubr.msk.f32.gmra.mrb[72].mxu0 %vm1060_vm6, %v1047_v53  ;;  %vm2006_vm6 = vcmask 1044224  }
 0x1a5   :  { %v1288_v55 = vpop.f32.mrb[20].mxu0 }
 0x1a6   :  { %v2857_v56 = vpop.f32.mrb[21].mxu0  ;;  %v1289_v57 = vadd.f32 %v4224_v28, %v1288_v55 }
 0x1a8   :  { %v1432_v62 = vmax.f32 %v1289_v57, 0.0 }
 0x1ad   :  { %v1293_v58 = vpop.f32.mrb[22].mxu0 }
 0x1ae   :  { %v1294_v59 = vadd.f32 %v4224_v28, %v1293_v58  ;;  %v2860_v60 = vpop.f32.mrb[23].mxu0 }
 0x1b0   :  { %v1433_v63 = vmax.f32 %v1294_v59, 0.0 }
 0x1b2   :  { %v4306_v0 = vpack.c.bf16 %v1433_v63, %v1432_v62 }
 0x1b5   :  { %v1298_v1 = vpop.f32.mrb[24].mxu0 }
 0x1b6   :  { %v2863_v2 = vpop.f32.mrb[25].mxu0  ;;  %v1299_v3 = vadd.f32 %v4224_v28, %v1298_v1 }
 0x1b8   :  { %v1434_v9 = vmax.f32 %v1299_v3, 0.0 }
 0x1bd   :  { %v1303_v6 = vpop.f32.mrb[26].mxu0 }
 0x1be   :  { %v1304_v7 = vadd.f32 %v4224_v28, %v1303_v6  ;;  %v2866_v8 = vpop.f32.mrb[27].mxu0 }
 0x1c0   :  { %v1435_v10 = vmax.f32 %v1304_v7, 0.0 }
 0x1c2   :  { %v4310_v11 = vpack.c.bf16 %v1435_v10, %v1434_v9 }
 0x1c5   :  { %v1308_v12 = vpop.f32.mrb[28].mxu0 }
 0x1c6   :  { %v2869_v13 = vpop.f32.mrb[29].mxu0  ;;  %v1309_v14 = vadd.f32 %v4224_v28, %v1308_v12 }
 0x1c8   :  { %v1436_v19 = vmax.f32 %v1309_v14, 0.0 }
 0x1cd   :  { %v1313_v15 = vpop.f32.mrb[30].mxu0 }
 0x1ce   :  { %v1314_v16 = vadd.f32 %v4224_v28, %v1313_v15  ;;  %v2872_v17 = vpop.f32.mrb[31].mxu0 }
 0x1d0   :  { %v1437_v20 = vmax.f32 %v1314_v16, 0.0 }
 0x1d2   :  { %v4314_v21 = vpack.c.bf16 %v1437_v20, %v1436_v19 }
 0x1d5   :  { %v1318_v23 = vpop.f32.mrb[32].mxu0 }
 0x1d6   :  { %v2875_v25 = vpop.f32.mrb[33].mxu0  ;;  %v1319_v26 = vadd.f32 %v4224_v28, %v1318_v23 }
 0x1d8   :  { %v1438_v31 = vmax.f32 %v1319_v26, 0.0 }
 0x1dd   :  { %v1323_v27 = vpop.f32.mrb[34].mxu0 }
 0x1de   :  { %v1324_v29 = vadd.f32 %v4224_v28, %v1323_v27  ;;  %v2878_v30 = vpop.f32.mrb[35].mxu0 }
 0x1e0   :  { %v1439_v32 = vmax.f32 %v1324_v29, 0.0 }
 0x1e2   :  { %v3025_v33 = vpack.c.bf16 %v1439_v32, %v1438_v31 }
 0x1e4   :  { %3026 = vmatprep.subr.bf16.mxu1 %v3025_v33 }
 0x1e5   :  { %v1328_v34 = vpop.f32.mrb[36].mxu0  ;;  %3028 = vmatpush3.bf16.msra.mxu1 %v4238_v42 }
 0x1e6   :  { %v2881_v35 = vpop.f32.mrb[37].mxu0  ;;  %v1329_v36 = vadd.f32 %v4224_v28, %v1328_v34 }
 0x1e8   :  { %v1440_v41 = vmax.f32 %v1329_v36, 0.0 }
 0x1ed   :  { %v1333_v37 = vpop.f32.mrb[38].mxu0 }
 0x1ee   :  { %v1334_v39 = vadd.f32 %v4224_v28, %v1333_v37  ;;  %v2884_v40 = vpop.f32.mrb[39].mxu0 }
 0x1ef   :  { %v1461_v40 = vld [vmem:[%s4753_s3 + $0xc] sm:$0xff] }
 0x1f0   :  { %v1441_v43 = vmax.f32 %v1334_v39, 0.0 }
 0x1f2   :  { %v3029_v44 = vpack.c.bf16 %v1441_v43, %v1440_v41  ;;  %v1487_v41 = vunpack.c.l.bf16 %v4319_v22 }
 0x1f4   :  { %3030 = vmatprep.subr.bf16.mxu1 %v3029_v44 }
 0x1f5   :  { %v1338_v45 = vpop.f32.mrb[40].mxu0  ;;  %3032 = vmatpush3.bf16.msra.mxu1 %v4254_v61 }
 0x1f6   :  { %v2887_v46 = vpop.f32.mrb[41].mxu0  ;;  %v1339_v47 = vadd.f32 %v4224_v28, %v1338_v45  ;;  %v1463_v45 = vld [vmem:[%s4753_s3 + $0x18] sm:$0xff] }
 0x1f7   :  { %v1490_v46 = vunpack.c.l.bf16 %v1461_v40  ;;  %v1493_v22 = vunpack.c.l.bf16 %v1463_v45 }
 0x1f8   :  { %v1442_v50 = vmax.f32 %v1339_v47, 0.0  ;;  %v1494_v47 = vunpack.c.h.bf16 %v1463_v45  ;;  %v1468_v45 = vld [vmem:[%s4753_s3 + $0x38] ss:$12 sps:$4 sm:$0xff]  }
 0x1fd   :  { %v1343_v48 = vpop.f32.mrb[42].mxu0 }
 0x1fe   :  { %v1344_v42 = vadd.f32 %v4224_v28, %v1343_v48  ;;  %v2890_v49 = vpop.f32.mrb[43].mxu0 }
 0x200   :  { %v1443_v51 = vmax.f32 %v1344_v42, 0.0  ;;  %v1465_v42 = vld [vmem:[%s4753_s3 + $0x24] sm:$0xff] }
 0x202   :  { %v3033_v52 = vpack.c.bf16 %v1443_v51, %v1442_v50 }
 0x204   :  { %3034 = vmatprep.subr.bf16.mxu1 %v3033_v52 }
 0x205   :  { %v1348_v53 = vpop.f32.mrb[44].mxu0  ;;  %3036 = vmatpush3.bf16.msra.mxu1 %v4272_v18 }
 0x206   :  { %v2893_v55 = vpop.f32.mrb[45].mxu0  ;;  %v1349_v56 = vadd.f32 %v4224_v28, %v1348_v53  ;;  %v1467_v53 = vld [vmem:[%s4753_s3 + $0x30] sm:$0xff] }
 0x208   :  { %v1444_v59 = vmax.f32 %v1349_v56, 0.0  ;;  %v1496_v56 = vunpack.c.l.bf16 %v1465_v42 }
 0x20d   :  { %v1353_v57 = vpop.f32.mrb[46].mxu0 }
 0x20e   :  { %v1354_v61 = vadd.f32 %v4224_v28, %v1353_v57  ;;  %v2896_v58 = vpop.f32.mrb[47].mxu0  ;;  %v1500_v57 = vunpack.c.h.bf16 %v1467_v53 }
 0x20f   :  { %v1469_v58 = vld [vmem:[%s4753_s3 + $0x3c] sm:$0xff] }
 0x210   :  { %v1445_v60 = vmax.f32 %v1354_v61, 0.0 }
 0x212   :  { %v3037_v62 = vpack.c.bf16 %v1445_v60, %v1444_v59  ;;  %v1499_v59 = vunpack.c.l.bf16 %v1467_v53 }
 0x214   :  { %3038 = vmatprep.subr.bf16.mxu1 %v3037_v62  ;;  %v1503_v62 = vunpack.c.h.bf16 %v1469_v58 }
 0x215   :  { %v1358_v63 = vpop.f32.mrb[48].mxu0  ;;  %3040 = vmatpush3.bf16.msra.mxu1 %v4290_v38 }
 0x216   :  { %v2899_v1 = vpop.f32.mrb[49].mxu0  ;;  %v1359_v2 = vadd.f32 %v4224_v28, %v1358_v63 }
 0x217   :  { %v1471_v1 = vld [vmem:[%s4753_s3 + $0x48] sm:$0xff] }
 0x218   :  { %v1446_v7 = vmax.f32 %v1359_v2, 0.0  ;;  %v1502_v2 = vunpack.c.l.bf16 %v1469_v58  ;;  %v2036_v58 = vld [vmem:[%s4754_s4] sm:$0xff] }
 0x21d   :  { %v1363_v3 = vpop.f32.mrb[50].mxu0 }
 0x21e   :  { %v1364_v18 = vadd.f32 %v4224_v28, %v1363_v3  ;;  %v2902_v6 = vpop.f32.mrb[51].mxu0  ;;  %v1506_v3 = vunpack.c.h.bf16 %v1471_v1 }
 0x21f   :  { %v1473_v6 = vld [vmem:[%s4753_s3 + $0x54] sm:$0xff] }
 0x220   :  { %v1447_v8 = vmax.f32 %v1364_v18, 0.0 }
 0x222   :  { %v3041_v9 = vpack.c.bf16 %v1447_v8, %v1446_v7  ;;  %v1505_v7 = vunpack.c.l.bf16 %v1471_v1 }
 0x224   :  { %3042 = vmatprep.subr.bf16.mxu1 %v3041_v9  ;;  %v1509_v9 = vunpack.c.h.bf16 %v1473_v6 }
 0x225   :  { %v1368_v10 = vpop.f32.mrb[52].mxu0  ;;  %3044 = vmatpush3.bf16.msra.mxu1 %v4301_v54 }
 0x226   :  { %v2905_v12 = vpop.f32.mrb[53].mxu0  ;;  %v1369_v13 = vadd.f32 %v4224_v28, %v1368_v10 }
 0x228   :  { %v1448_v16 = vmax.f32 %v1369_v13, 0.0 }
 0x22d   :  { %v1373_v14 = vpop.f32.mrb[54].mxu0 }
 0x22e   :  { %v1374_v38 = vadd.f32 %v4224_v28, %v1373_v14  ;;  %v2908_v15 = vpop.f32.mrb[55].mxu0  ;;  %v1475_v14 = vld [vmem:[%s4753_s3 + $0x60] sm:$0xff] }
 0x22f   :  { %v1508_v15 = vunpack.c.l.bf16 %v1473_v6  ;;  %v2040_v6 = vld [vmem:[%s4754_s4 + $0x20] sm:$0xff] }
 0x230   :  { %v1449_v17 = vmax.f32 %v1374_v38, 0.0 }
 0x232   :  { %v3045_v19 = vpack.c.bf16 %v1449_v17, %v1448_v16  ;;  %v1512_v16 = vunpack.c.h.bf16 %v1475_v14 }
 0x234   :  { %3046 = vmatprep.subr.bf16.mxu1 %v3045_v19  ;;  %v1477_v19 = vld [vmem:[%s4753_s3 + $0x6c] sm:$0xff] }
 0x235   :  { %v1378_v20 = vpop.f32.mrb[56].mxu0  ;;  %3048 = vmatpush3.bf16.msra.mxu1 %v4306_v0 }
 0x236   :  { %v2911_v23 = vpop.f32.mrb[57].mxu0  ;;  %v1379_v24 = vadd.f32 %v4224_v28, %v1378_v20  ;;  %v1511_v20 = vunpack.c.l.bf16 %v1475_v14  ;;  %v2043_v14 = vld [vmem:[%s4754_s4 + $0x38] sm:$0xff] }
 0x237   :  { %v1515_v23 = vunpack.c.h.bf16 %v1477_v19 }
 0x238   :  { %v1450_v27 = vmax.f32 %v1379_v24, 0.0 }
 0x23d   :  { %v1383_v25 = vpop.f32.mrb[58].mxu0 }
 0x23e   :  { %v1384_v54 = vadd.f32 %v4224_v28, %v1383_v25  ;;  %v2914_v26 = vpop.f32.mrb[59].mxu0  ;;  %v1479_v25 = vld [vmem:[%s4753_s3 + $0x78] sm:$0xff] }
 0x240   :  { %v1451_v29 = vmax.f32 %v1384_v54, 0.0 }
 0x242   :  { %v3049_v30 = vpack.c.bf16 %v1451_v29, %v1450_v27  ;;  %v1514_v27 = vunpack.c.l.bf16 %v1477_v19  ;;  %v2044_v19 = vld [vmem:[%s4754_s4 + $0x40] sm:$0xff] }
 0x244   :  { %3050 = vmatprep.subr.bf16.mxu1 %v3049_v30  ;;  %v1518_v30 = vunpack.c.h.bf16 %v1479_v25 }
 0x245   :  { %v1388_v31 = vpop.f32.mrb[60].mxu0  ;;  %3052 = vmatpush3.bf16.msra.mxu1 %v4310_v11  ;;  %v1491_v11 = vunpack.c.h.bf16 %v1461_v40 }
 0x246   :  { %v2917_v32 = vpop.f32.mrb[61].mxu0  ;;  %v1389_v33 = vadd.f32 %v4224_v28, %v1388_v31  ;;  %v1481_v31 = vld [vmem:[%s4753_s3 + $0x84] sm:$0xff] }
 0x247   :  { %v1517_v32 = vunpack.c.l.bf16 %v1479_v25 }
 0x248   :  { %v1452_v36 = vmax.f32 %v1389_v33, 0.0  ;;  %v1483_v33 = vld [vmem:[%s4753_s3 + $0x90] sm:$0xff] }
 0x24d   :  { %v1393_v34 = vpop.f32.mrb[62].mxu0 }
 0x24e   :  { %v1394_v0 = vadd.f32 %v4224_v28, %v1393_v34  ;;  %v2920_v35 = vpop.f32.mrb[63].mxu0  ;;  %v1520_v34 = vunpack.c.l.bf16 %v1481_v31 }
 0x24f   :  { %v1485_v35 = vld [vmem:[%s4753_s3 + $0x9c] sm:$0xff] }
 0x250   :  { %v1453_v37 = vmax.f32 %v1394_v0, 0.0  ;;  %v1524_v0 = vunpack.c.h.bf16 %v1483_v33  ;;  %v1526_v40 = vunpack.c.l.bf16 %v1485_v35 }
 0x252   :  { %v3053_v39 = vpack.c.bf16 %v1453_v37, %v1452_v36  ;;  %v1523_v36 = vunpack.c.l.bf16 %v1483_v33  ;;  %v1527_v37 = vunpack.c.h.bf16 %v1485_v35  ;;  %v2049_v33 = vld [vmem:[%s4754_s4 + $0x68] sm:$0xff] }
 0x254   :  { %3054 = vmatprep.subr.bf16.mxu1 %v3053_v39  ;;  %v1460_v39 = vld [vmem:[%s4753_s3 + $0x8] ss:$12 sps:$4 sm:$0xff]  }
 0x255   :  { %v1398_v43 = vpop.f32.mrb[64].mxu0  ;;  %3056 = vmatpush3.bf16.msra.mxu1 %v4314_v21  ;;  %v1497_v21 = vunpack.c.h.bf16 %v1465_v42  ;;  %v1504_v42 = vunpack.c.h.bf16 %v1468_v45 }
 0x256   :  { %v2923_v44 = vpop.f32.mrb[65].mxu0  ;;  %v1399_v48 = vadd.f32 %v4224_v28, %v1398_v43  ;;  %v1464_v43 = vld [vmem:[%s4753_s3 + $0x20] ss:$12 sps:$4 sm:$0xff]  }
 0x257   :  { %v1495_v44 = vunpack.c.l.bf16 %v1464_v43 }
 0x258   :  { %1641 = vmatmul.mubr.f32.vlgmr.msra.gmra.mrb[0].mxu1 %v1487_v41  ;;  %v1454_v50 = vmax.f32 %v1399_v48, 0.0  ;;  %v1489_v41 = vunpack.c.l.bf16 %v1460_v39  ;;  %v1472_v48 = vld [vmem:[%s4753_s3 + $0x50] ss:$12 sps:$4 sm:$0xff]  }
 0x259   :  { %1645 = vmatprep.mubr.f32.mxu1 %v1491_v11  ;;  %v1492_v11 = vunpack.c.h.bf16 %v1460_v39 }
 0x25c   :  { %1646 = vmatmul.mubr.f32.gmra.mrb[2].mxu1 %v1490_v46  ;;  %v1498_v46 = vunpack.c.h.bf16 %v1464_v43 }
 0x25d   :  { %v1403_v49 = vpop.f32.mrb[66].mxu0  ;;  %1650 = vmatprep.mubr.f32.mxu1 %v1494_v47  ;;  %v1501_v47 = vunpack.c.l.bf16 %v1468_v45 }
 0x25e   :  { %v1404_v51 = vadd.f32 %v4224_v28, %v1403_v49  ;;  %v2926_v52 = vpop.f32.mrb[67].mxu0  ;;  %v1476_v49 = vld [vmem:[%s4753_s3 + $0x68] ss:$12 sps:$4 sm:$0xff]  }
 0x25f   :  { %v1516_v52 = vunpack.c.h.bf16 %v1476_v49 }
 0x260   :  { %v1455_v55 = vmax.f32 %v1404_v51, 0.0  ;;  %1651 = vmatmul.mubr.f32.gmra.mrb[4].mxu1 %v1493_v22  ;;  %v1507_v22 = vunpack.c.l.bf16 %v1472_v48  ;;  %v1480_v51 = vld [vmem:[%s4753_s3 + $0x80] ss:$12 sps:$4 sm:$0xff]  }
 0x261   :  { %1655 = vmatprep.mubr.f32.mxu1 %v1497_v21  ;;  %v1510_v21 = vunpack.c.h.bf16 %v1472_v48  ;;  %v1519_v53 = vunpack.c.l.bf16 %v1480_v51 }
 0x262   :  { %v3057_v61 = vpack.c.bf16 %v1455_v55, %v1454_v50  ;;  %v1513_v50 = vunpack.c.l.bf16 %v1476_v49  ;;  %v1484_v55 = vld [vmem:[%s4753_s3 + $0x98] ss:$12 sps:$4 sm:$0xff]  }
 0x264   :  { %1656 = vmatmul.mubr.f32.gmra.mrb[6].mxu1 %v1496_v56  ;;  %3058 = vmatprep.subr.bf16.mxu1 %v3057_v61  ;;  %v1522_v56 = vunpack.c.h.bf16 %v1480_v51 }
 0x265   :  { %3060 = vmatpush3.bf16.msra.mxu1 %v3057_v61  ;;  %v1408_v60 = vpop.f32.mrb[68].mxu0  ;;  %1660 = vmatprep.mubr.f32.mxu1 %v1500_v57  ;;  %v1525_v57 = vunpack.c.l.bf16 %v1484_v55  ;;  %v1528_v61 = vunpack.c.h.bf16 %v1484_v55 }
 0x266   :  { %v2929_v63 = vpop.f32.mrb[69].mxu0  ;;  %v1409_v18 = vadd.f32 %v4224_v28, %v1408_v60  ;;  %v2038_v60 = vld [vmem:[%s4754_s4 + $0x10] sm:$0xff] }
 0x267   :  { %v2039_v63 = vld [vmem:[%s4754_s4 + $0x18] sm:$0xff] }
 0x268   :  { %1661 = vmatmul.mubr.f32.gmra.mrb[8].mxu1 %v1499_v59  ;;  %v1456_v10 = vmax.f32 %v1409_v18, 0.0  ;;  %v2037_v59 = vld [vmem:[%s4754_s4 + $0x8] sm:$0xff] }
 0x269   :  { %1665 = vmatprep.mubr.f32.mxu1 %v1503_v62  ;;  %v3066_v62 = vpack.c.bf16 %v2037_v59, %v2036_v58 }
 0x26c   :  { %1666 = vmatmul.mubr.f32.gmra.mrb[10].mxu1 %v1502_v2 }
 0x26d   :  { %v1413_v8 = vpop.f32.mrb[70].mxu0  ;;  %1670 = vmatprep.mubr.f32.mxu1 %v1506_v3  ;;  %v3069_v3 = vpack.c.bf16 %v2039_v63, %v2038_v60 }
 0x26e   :  { %v1414_v12 = vadd.f32 %v4224_v28, %v1413_v8  ;;  %v2932_v13 = vpop.f32.mrb[71].mxu0 }
 0x26f   :  { %v2042_v13 = vld [vmem:[%s4754_s4 + $0x30] sm:$0xff] }
 0x270   :  { %v1457_v38 = vmax.f32 %v1414_v12, 0.0  ;;  %1671 = vmatmul.mubr.f32.gmra.mrb[12].mxu1 %v1505_v7  ;;  %v2041_v7 = vld [vmem:[%s4754_s4 + $0x28] sm:$0xff] }
 0x271   :  { %1675 = vmatprep.mubr.f32.mxu1 %v1509_v9 }
 0x272   :  { %v3061_v17 = vpack.c.bf16 %v1457_v38, %v1456_v10  ;;  %v3072_v10 = vpack.c.bf16 %v2041_v7, %v2040_v6 }
 0x274   :  { %1676 = vmatmul.mubr.f32.gmra.mrb[14].mxu1 %v1508_v15  ;;  %3062 = vmatprep.subr.bf16.mxu1 %v3061_v17 }
 0x275   :  { %3064 = vmatpush3.bf16.msra.mxu1 %v3061_v17  ;;  %1680 = vmatprep.mubr.f32.mxu1 %v1512_v16  ;;  %v1418_v24 = vpop.f32.mrb[72].mxu0  ;;  %v3075_v16 = vpack.c.bf16 %v2043_v14, %v2042_v13 }
 0x276   :  { %v1419_v54 = vadd.f32 %v4224_v28, %v1418_v24  ;;  %v2935_v26 = vpop.f32.mrb[73].mxu0  ;;  %v1521_v28 = vunpack.c.h.bf16 %v1481_v31 }
 0x277   :  { %v2046_v26 = vld [vmem:[%s4754_s4 + $0x50] sm:$0xff] }
 0x278   :  { %1681 = vmatmul.mubr.f32.gmra.mrb[16].mxu1 %v1511_v20  ;;  %v1458_v29 = vmax.f32 %v1419_v54, 0.0  ;;  %v2045_v20 = vld [vmem:[%s4754_s4 + $0x48] sm:$0xff] }
 0x279   :  { %1685 = vmatprep.mubr.f32.mxu1 %v1515_v23  ;;  %v3078_v25 = vpack.c.bf16 %v2045_v20, %v2044_v19 }
 0x27a   :  { %2944 = vmatprep.subr.msk.mxu1 %vm1572_vm12, %v1458_v29 }
 0x27b   :  { %2945 = vmatpush3.msk.msra.mxu1 %vm1572_vm12, %v1458_v29 }
 0x27c   :  { %1686 = vmatmul.mubr.f32.gmra.mrb[18].mxu1 %v1514_v27  ;;  %3065 = vmatprep.subr.bf16.mxu1 %v3199_v4  ;;  %v2047_v27 = vld [vmem:[%s4754_s4 + $0x58] sm:$0xff] }
 0x27d   :  { %1690 = vmatprep.mubr.f32.mxu1 %v1518_v30  ;;  %v3081_v31 = vpack.c.bf16 %v2047_v27, %v2046_v26 }
 0x280   :  { %1691 = vmatmul.mubr.f32.gmra.mrb[20].mxu1 %v1517_v32 }
 0x281   :  { %1695 = vmatprep.mubr.f32.mxu1 %v1521_v28  ;;  %v2048_v28 = vld [vmem:[%s4754_s4 + $0x60] sm:$0xff] }
 0x282   :  { %v3084_v35 = vpack.c.bf16 %v2049_v33, %v2048_v28 }
 0x284   :  { %1696 = vmatmul.mubr.f32.gmra.mrb[22].mxu1 %v1520_v34 }
 0x285   :  { %1700 = vmatprep.mubr.f32.mxu1 %v1524_v0 }
 0x288   :  { %1701 = vmatmul.mubr.f32.gmra.mrb[24].mxu1 %v1523_v36 }
 0x289   :  { %1705 = vmatprep.mubr.f32.mxu1 %v1527_v37 }
 0x28c   :  { %1706 = vmatmul.mubr.f32.gmra.mrb[26].mxu1 %v1526_v40 }
 0x28d   :  { %2946 = vmatprep.mubr.msk.f32.mxu1 %vm1529_vm13, %v1489_v41 }
 0x290   :  { %2947 = vmatmul.mubr.msk.f32.vlgmr.msra.gmra.mrb[28].mxu1 %vm1529_vm13, %v1492_v11 }
 0x291   :  { %2949 = vmatprep.mubr.msk.f32.mxu1 %vm1529_vm13, %v1495_v44  ;;  %3067 = vmatpush1.bf16.msra.mxu1 %v3066_v62 }
 0x292   :  { %3068 = vmatprep.subr.bf16.mxu1 %v3199_v4 }
 0x294   :  { %2950 = vmatmul.mubr.msk.f32.gmra.mrb[30].mxu1 %vm1529_vm13, %v1498_v46 }
 0x295   :  { %2952 = vmatprep.mubr.msk.f32.mxu1 %vm1529_vm13, %v1501_v47  ;;  %3070 = vmatpush1.bf16.msra.mxu1 %v3069_v3 }
 0x296   :  { %3071 = vmatprep.subr.bf16.mxu1 %v3199_v4 }
 0x298   :  { %2953 = vmatmul.mubr.msk.f32.gmra.mrb[32].mxu1 %vm1529_vm13, %v1504_v42 }
 0x299   :  { %2955 = vmatprep.mubr.msk.f32.mxu1 %vm1529_vm13, %v1507_v22  ;;  %3073 = vmatpush1.bf16.msra.mxu1 %v3072_v10 }
 0x29a   :  { %3074 = vmatprep.subr.bf16.mxu1 %v3199_v4 }
 0x29c   :  { %2956 = vmatmul.mubr.msk.f32.gmra.mrb[34].mxu1 %vm1529_vm13, %v1510_v21 }
 0x29d   :  { %2958 = vmatprep.mubr.msk.f32.mxu1 %vm1529_vm13, %v1513_v50  ;;  %3076 = vmatpush1.bf16.msra.mxu1 %v3075_v16 }
 0x29e   :  { %3077 = vmatprep.subr.bf16.mxu1 %v3199_v4 }
 0x2a0   :  { %2959 = vmatmul.mubr.msk.f32.gmra.mrb[36].mxu1 %vm1529_vm13, %v1516_v52 }
 0x2a1   :  { %2961 = vmatprep.mubr.msk.f32.mxu1 %vm1529_vm13, %v1519_v53  ;;  %3079 = vmatpush1.bf16.msra.mxu1 %v3078_v25 }
 0x2a2   :  { %3080 = vmatprep.subr.bf16.mxu1 %v3199_v4 }
 0x2a4   :  { %2962 = vmatmul.mubr.msk.f32.gmra.mrb[38].mxu1 %vm1529_vm13, %v1522_v56 }
 0x2a5   :  { %2964 = vmatprep.mubr.msk.f32.mxu1 %vm1529_vm13, %v1525_v57  ;;  %3082 = vmatpush1.bf16.msra.mxu1 %v3081_v31  ;;  %v2053_v31 = vld [vmem:[%s4754_s4 + $0x88] sm:$0xff] }
 0x2a6   :  { %3083 = vmatprep.subr.bf16.mxu1 %v3199_v4 }
 0x2a8   :  { %2965 = vmatmul.mubr.msk.f32.gmra.mrb[40].mxu1 %vm1529_vm13, %v1528_v61 }
 0x2a9   :  { %3085 = vmatpush1.bf16.msra.mxu1 %v3084_v35 }
 0x2aa   :  { %3086 = vmatprep.subr.bf16.mxu1 %v3199_v4 }
 0x32b   :  { %v2693_v1 = vpop.f32.mrb[0].mxu1 }
 0x32c   :  { %v2694_v2 = vpop.f32.mrb[1].mxu1 }
 0x32d   :  { %v4441_v18 = vadd.f32 %v2694_v2, %v2693_v1 }
 0x32f   :  { %v2696_v8 = vpop.f32.mrb[2].mxu1 }
 0x330   :  { %v2697_v9 = vpop.f32.mrb[3].mxu1 }
 0x331   :  { %v2698_v12 = vadd.f32 %v2697_v9, %v2696_v8 }
 0x333   :  { %v2699_v38 = vpop.f32.mrb[4].mxu1 }
 0x334   :  { %v2700_v15 = vpop.f32.mrb[5].mxu1 }
 0x335   :  { %v2701_v17 = vadd.f32 %v2700_v15, %v2699_v38 }
 0x337   :  { %v2702_v23 = vpop.f32.mrb[6].mxu1 }
 0x338   :  { %v2703_v24 = vpop.f32.mrb[7].mxu1 }
 0x339   :  { %v2704_v54 = vadd.f32 %v2703_v24, %v2702_v23 }
 0x33b   :  { %v2705_v29 = vpop.f32.mrb[8].mxu1 }
 0x33c   :  { %v2706_v30 = vpop.f32.mrb[9].mxu1 }
 0x33d   :  { %v2707_v32 = vadd.f32 %v2706_v30, %v2705_v29  ;;  %v2052_v30 = vld [vmem:[%s4754_s4 + $0x80] sm:$0xff] }
 0x33e   :  { %v3090_v28 = vpack.c.bf16 %v2053_v31, %v2052_v30 }
 0x33f   :  { %v2708_v34 = vpop.f32.mrb[10].mxu1 }
 0x340   :  { %v2709_v0 = vpop.f32.mrb[11].mxu1 }
 0x341   :  { %v2710_v36 = vadd.f32 %v2709_v0, %v2708_v34 }
 0x343   :  { %v2711_v37 = vpop.f32.mrb[12].mxu1 }
 0x344   :  { %v2712_v39 = vpop.f32.mrb[13].mxu1 }
 0x345   :  { %v2713_v40 = vadd.f32 %v2712_v39, %v2711_v37  ;;  %v2054_v39 = vld [vmem:[%s4754_s4 + $0x90] sm:$0xff] }
 0x347   :  { %v2714_v41 = vpop.f32.mrb[14].mxu1 }
 0x348   :  { %v2715_v43 = vpop.f32.mrb[15].mxu1 }
 0x349   :  { %v2716_v11 = vadd.f32 %v2715_v43, %v2714_v41 }
 0x34b   :  { %v2717_v44 = vpop.f32.mrb[16].mxu1 }
 0x34c   :  { %v2718_v45 = vpop.f32.mrb[17].mxu1 }
 0x34d   :  { %v2719_v46 = vadd.f32 %v2718_v45, %v2717_v44 }
 0x34f   :  { %v2720_v47 = vpop.f32.mrb[18].mxu1 }
 0x350   :  { %v2721_v48 = vpop.f32.mrb[19].mxu1 }
 0x351   :  { %v2722_v42 = vadd.f32 %v2721_v48, %v2720_v47 }
 0x353   :  { %v2723_v22 = vpop.f32.mrb[20].mxu1 }
 0x354   :  { %v2724_v49 = vpop.f32.mrb[21].mxu1 }
 0x355   :  { %v2725_v21 = vadd.f32 %v2724_v49, %v2723_v22 }
 0x357   :  { %v2726_v50 = vpop.f32.mrb[22].mxu1 }
 0x358   :  { %v2727_v51 = vpop.f32.mrb[23].mxu1 }
 0x359   :  { %v2728_v52 = vadd.f32 %v2727_v51, %v2726_v50 }
 0x35b   :  { %v2729_v53 = vpop.f32.mrb[24].mxu1 }
 0x35c   :  { %v2730_v55 = vpop.f32.mrb[25].mxu1 }
 0x35d   :  { %v2731_v56 = vadd.f32 %v2730_v55, %v2729_v53 }
 0x35f   :  { %v2732_v57 = vpop.f32.mrb[26].mxu1 }
 0x360   :  { %v2733_v61 = vpop.f32.mrb[27].mxu1 }
 0x361   :  { %v2734_v58 = vadd.f32 %v2733_v61, %v2732_v57 }
 0x363   :  { %v2948_v59 = vpop.f32.mrb[28].mxu1 }
 0x364   :  { %v1783_v60 = vadd.f32 %v2948_v59, %v2698_v12  ;;  %v1777_v62 = vpop.f32.mrb[29].mxu1 }
 0x365   :  { %v1778_v63 = vadd.f32 %v4441_v18, %v1777_v62  ;;  %v2050_v18 = vld [vmem:[%s4754_s4 + $0x70] sm:$0xff] }
 0x367   :  { %v2951_v1 = vpop.f32.mrb[30].mxu1 }
 0x368   :  { %v1793_v2 = vadd.f32 %v2951_v1, %v2704_v54  ;;  %v1787_v3 = vpop.f32.mrb[31].mxu1 }
 0x369   :  { %v1788_v6 = vadd.f32 %v2701_v17, %v1787_v3  ;;  %v2051_v17 = vld [vmem:[%s4754_s4 + $0x78] sm:$0xff] }
 0x36a   :  { %v3087_v24 = vpack.c.bf16 %v2051_v17, %v2050_v18 }
 0x36b   :  { %v2954_v7 = vpop.f32.mrb[32].mxu1 }
 0x36c   :  { %v1803_v8 = vadd.f32 %v2954_v7, %v2710_v36  ;;  %v1797_v9 = vpop.f32.mrb[33].mxu1  ;;  %3088 = vmatpush1.bf16.msra.mxu1 %v3087_v24 }
 0x36d   :  { %v1798_v10 = vadd.f32 %v2707_v32, %v1797_v9  ;;  %3089 = vmatprep.subr.bf16.mxu1 %v3199_v4 }
 0x36f   :  { %v2957_v13 = vpop.f32.mrb[34].mxu1 }
 0x370   :  { %v1813_v14 = vadd.f32 %v2957_v13, %v2716_v11  ;;  %v1807_v38 = vpop.f32.mrb[35].mxu1  ;;  %3091 = vmatpush1.bf16.msra.mxu1 %v3090_v28 }
 0x371   :  { %v1808_v15 = vadd.f32 %v2713_v40, %v1807_v38  ;;  %3092 = vmatprep.subr.bf16.mxu1 %v3199_v4  ;;  %v2055_v40 = vld [vmem:[%s4754_s4 + $0x98] sm:$0xff]  ;;  %s3205_s4 = smov 96  }
 0x372   :  { %v1846_v16 = vmax.f32 %v1778_v63, %v1813_v14  ;;  %v3093_v43 = vpack.c.bf16 %v2055_v40, %v2054_v39 }
 0x373   :  { %v2960_v19 = vpop.f32.mrb[36].mxu1 }
 0x374   :  { %1854 = vst.msk [vmem:[#allocation3] sm:$0xff] %vm1853_vm14, %v1846_v16  ;;  %v1823_v12 = vadd.f32 %v2960_v19, %v2722_v42  ;;  %v1817_v20 = vpop.f32.mrb[37].mxu1  ;;  %3094 = vmatpush1.bf16.msra.mxu1 %v3093_v43 }
 0x375   :  { %v1818_v23 = vadd.f32 %v2719_v46, %v1817_v20 }
 0x376   :  { %v1848_v25 = vmax.f32 %v1788_v6, %v1823_v12 }
 0x377   :  { %v1847_v54 = vmax.f32 %v1783_v60, %v1818_v23  ;;  %v2963_v26 = vpop.f32.mrb[38].mxu1 }
 0x378   :  { %1856 = vst.msk [vmem:[#allocation3 + $0x10] sm:$0xff] %vm1853_vm14, %v1848_v25  ;;  %v1833_v27 = vadd.f32 %v2963_v26, %v2728_v52  ;;  %v1827_v29 = vpop.f32.mrb[39].mxu1 }
 0x379   :  { %1855 = vst.msk [vmem:[#allocation3 + $0x8] sm:$0xff] %vm1853_vm14, %v1847_v54  ;;  %v1828_v32 = vadd.f32 %v2725_v21, %v1827_v29 }
 0x37a   :  { %v1850_v33 = vmax.f32 %v1798_v10, %v1833_v27 }
 0x37b   :  { %v1849_v34 = vmax.f32 %v1793_v2, %v1828_v32  ;;  %v2966_v0 = vpop.f32.mrb[40].mxu1  ;;  %v1861_v35 = vld [vmem:[#allocation3] sm:$0xff] }
 0x37c   :  { %1858 = vst.msk [vmem:[#allocation3 + $0x20] sm:$0xff] %vm1853_vm14, %v1850_v33  ;;  %v1843_v36 = vadd.f32 %v2966_v0, %v2734_v58  ;;  %v1837_v37 = vpop.f32.mrb[41].mxu1  ;;  %1868 = vst.msk [vmem:[#allocation4] sm:$0xff] %vm1853_vm14, %v1861_v35 }
 0x37d   :  { %1857 = vst.msk [vmem:[#allocation3 + $0x18] sm:$0xff] %vm1853_vm14, %v1849_v34  ;;  %v1838_v41 = vadd.f32 %v2731_v56, %v1837_v37 }
 0x37e   :  { %v1852_v11 = vmax.f32 %v1808_v15, %v1843_v36 }
 0x37f   :  { %v1851_v44 = vmax.f32 %v1803_v8, %v1838_v41  ;;  %v1863_v45 = vld [vmem:[#allocation3 + $0x10] sm:$0xff] }
 0x380   :  { %1860 = vst.msk [vmem:[#allocation3 + $0x30] sm:$0xff] %vm1853_vm14, %v1852_v11  ;;  %v1920_v46 = vld [vmem:[#allocation3 + $0x2] sm:$0xff]  ;;  %1870 = vst.msk [vmem:[#allocation4 + $0x20] sm:$0xff] %vm1853_vm14, %v1863_v45  ;;  %v2009_v22 = vld [vmem:[#allocation3 + $0xc] sm:$0xff] }
 0x381   :  { %v1876_v47 = vld [vmem:[#allocation3 + $0x1] sm:$0xff]  ;;  %1859 = vst.msk [vmem:[#allocation3 + $0x28] sm:$0xff] %vm1853_vm14, %v1851_v44  ;;  %1934 = vrot.lane.b32.xlu1 %v1920_v46, %s3204_s15  ;;  %2016 = vst.msk [vmem:[#allocation4 + $0x18] sm:$0xff] %vm1853_vm14, %v2009_v22  ;;  %v1877_v21 = vld [vmem:[#allocation3 + $0x9] sm:$0xff] }
 0x382   :  { %1890 = vrot.lane.b32.xlu0 %v1876_v47, %s3203_s28  ;;  %v2008_v48 = vld [vmem:[#allocation3 + $0x4] sm:$0xff] }
 0x383   :  { %2015 = vst.msk [vmem:[#allocation4 + $0x8] sm:$0xff] %vm1853_vm14, %v2008_v48  ;;  %v1862_v42 = vld [vmem:[#allocation3 + $0x8] sm:$0xff]  ;;  %v1865_v49 = vld [vmem:[#allocation3 + $0x20] sm:$0xff] }
 0x384   :  { %1869 = vst.msk [vmem:[#allocation4 + $0x10] sm:$0xff] %vm1853_vm14, %v1862_v42  ;;  %v1964_v50 = vld [vmem:[#allocation3 + $0x3] sm:$0xff]  ;;  %1872 = vst.msk [vmem:[#allocation4 + $0x40] sm:$0xff] %vm1853_vm14, %v1865_v49  ;;  %v1864_v51 = vld [vmem:[#allocation3 + $0x18] sm:$0xff] }
 0x385   :  { %1892 = vrot.lane.b32.xlu1 %v1877_v21, %s3203_s28  ;;  %v2010_v52 = vld [vmem:[#allocation3 + $0x14] sm:$0xff]  ;;  %v2011_v53 = vld [vmem:[#allocation3 + $0x1c] sm:$0xff]  ;;  %1871 = vst.msk [vmem:[#allocation4 + $0x30] sm:$0xff] %vm1853_vm14, %v1864_v51  ;;  %v1965_v55 = vld [vmem:[#allocation3 + $0xb] sm:$0xff] }
 0x386   :  { %1978 = vrot.lane.b32.xlu0 %v1964_v50, %s3205_s4  ;;  %2017 = vst.msk [vmem:[#allocation4 + $0x28] sm:$0xff] %vm1853_vm14, %v2010_v52  ;;  %2018 = vst.msk [vmem:[#allocation4 + $0x38] sm:$0xff] %vm1853_vm14, %v2011_v53  ;;  %v1921_v56 = vld [vmem:[#allocation3 + $0xa] sm:$0xff]  ;;  %v1922_v62 = vld [vmem:[#allocation3 + $0x12] sm:$0xff] }
 0x387   :  { %v1867_v59 = vld [vmem:[#allocation3 + $0x30] sm:$0xf]  ;;  %v2014_v60 = vld [vmem:[#allocation3 + $0x34] sm:$0xf]  ;;  %v1879_v2 = vld [vmem:[#allocation3 + $0x19] sm:$0xff] }
 0x388   :  { %v1866_v61 = vld [vmem:[#allocation3 + $0x28] sm:$0xff]  ;;  %v1878_v63 = vld [vmem:[#allocation3 + $0x11] sm:$0xff]  ;;  %1875 = vst.msk [vmem:[#allocation4 + $0x60] sm:$0xf] %vm1874_vm15, %v1867_v59  ;;  %2021 = vst.msk [vmem:[#allocation4 + $0x68] sm:$0xf] %vm1874_vm15, %v2014_v60 }
 0x389   :  { %1980 = vrot.lane.b32.xlu1 %v1965_v55, %s3205_s4  ;;  %1873 = vst.msk [vmem:[#allocation4 + $0x50] sm:$0xff] %vm1853_vm14, %v1866_v61  ;;  %v2012_v58 = vld [vmem:[#allocation3 + $0x24] sm:$0xff]  ;;  %v2013_v1 = vld [vmem:[#allocation3 + $0x2c] sm:$0xff]  ;;  %v1967_v6 = vld [vmem:[#allocation3 + $0x1b] sm:$0xff] }
 0x38a   :  { %v2023_v57 = vld [vmem:[#allocation4 + $0x8] sm:$0xff]  ;;  %1936 = vrot.lane.b32.xlu0 %v1921_v56, %s3204_s15  ;;  %2019 = vst.msk [vmem:[#allocation4 + $0x48] sm:$0xff] %vm1853_vm14, %v2012_v58  ;;  %2020 = vst.msk [vmem:[#allocation4 + $0x58] sm:$0xff] %vm1853_vm14, %v2013_v1  ;;  %v1966_v3 = vld [vmem:[#allocation3 + $0x13] sm:$0xff] }
 0x38b   :  { %2600 = vmatprep.mubr.msk.f32.mxu1 %vm1853_vm14, %v2023_v57  ;;  %v1923_v7 = vld [vmem:[#allocation3 + $0x1a] sm:$0xff]  ;;  %v1924_v8 = vld [vmem:[#allocation3 + $0x22] sm:$0xff]  ;;  %v1969_v14 = vld [vmem:[#allocation3 + $0x2b] sm:$0xff] }
 0x38c   :  { %v1880_v9 = vld [vmem:[#allocation3 + $0x21] sm:$0xff]  ;;  %v1881_v10 = vld [vmem:[#allocation3 + $0x29] sm:$0xff]  ;;  %v1926_v15 = vld [vmem:[#allocation3 + $0x32] sm:$0xf] }
 0x38d   :  { %1938 = vrot.lane.b32.xlu1 %v1922_v62, %s3204_s15  ;;  %v1968_v13 = vld [vmem:[#allocation3 + $0x23] sm:$0xff]  ;;  %v1882_v16 = vld [vmem:[#allocation3 + $0x31] sm:$0xf]  ;;  %v2616_v21 = vld [vmem:[%s4756_s6] sm:$0xff]  }
 0x38e   :  { %1894 = vrot.lane.b32.xlu0 %v1878_v63, %s3203_s28  ;;  %v1925_v38 = vld [vmem:[#allocation3 + $0x2a] sm:$0xff]  ;;  %v1970_v19 = vld [vmem:[#allocation3 + $0x33] sm:$0xf]  ;;  %v2027_v32 = vld [vmem:[#allocation4 + $0x28] sm:$0xff]  ;;  %v2617_v50 = vunpack.c.l.bf16 %v2616_v21 }
 0x38f   :  { %v2025_v27 = vld [vmem:[#allocation4 + $0x18] sm:$0xff]  ;;  %v2035_v22 = vld [vmem:[#allocation4 + $0x68] sm:$0xf]  ;;  %v2332_v51 = vld [vmem:[%s4757_s7 + $0x80] sm:$0xff] }
 0x390   :  { %v2029_v36 = vld [vmem:[#allocation4 + $0x38] sm:$0xff]  ;;  %v2333_v52 = vld [vmem:[%s4757_s7 + $0x88] sm:$0xff]  ;;  %v2316_v53 = vld [vmem:[%s4757_s7] sm:$0xff] }
 0x391   :  { %1896 = vrot.lane.b32.xlu1 %v1879_v2, %s3203_s28  ;;  %v2031_v41 = vld [vmem:[#allocation4 + $0x48] sm:$0xff]  ;;  %v2033_v47 = vld [vmem:[#allocation4 + $0x58] sm:$0xff]  ;;  %v3107_v55 = vpack.c.bf16 %v2333_v52, %v2332_v51  ;;  %v2599_v58 = vld [vmem:[%s4755_s5] ss:$0 sm:$0xff] }
 0x392   :  { %1982 = vrot.lane.b32.xlu0 %v1966_v3, %s3205_s4  ;;  %v2317_v56 = vld [vmem:[%s4757_s7 + $0x8] sm:$0xff]  ;;  %v2343_v51 = vld [vmem:[%s4757_s7 + $0xd8] sm:$0xff] }
 0x393   :  { %v3109_v57 = vpack.c.bf16 %v2317_v56, %v2316_v53  ;;  %3108 = vmatprep.subr.bf16.mxu0 %v3107_v55  ;;  %v2326_v55 = vld [vmem:[%s4757_s7 + $0x50] sm:$0xff]  ;;  %v2327_v56 = vld [vmem:[%s4757_s7 + $0x58] sm:$0xff] }
 0x395   :  { %1984 = vrot.lane.b32.xlu1 %v1967_v6, %s3205_s4  ;;  %3110 = vmatpush3.bf16.msra.mxu0 %v3109_v57  ;;  %v2344_v57 = vld [vmem:[%s4757_s7 + $0xe0] sm:$0xff] }
 0x396   :  { %1940 = vrot.lane.b32.xlu0 %v1923_v7, %s3204_s15 }
 0x399   :  { %1942 = vrot.lane.b32.xlu1 %v1924_v8, %s3204_s15 }
 0x39a   :  { %1898 = vrot.lane.b32.xlu0 %v1880_v9, %s3203_s28 }
 0x39d   :  { %1900 = vrot.lane.b32.xlu1 %v1881_v10, %s3203_s28 }
 0x39e   :  { %1986 = vrot.lane.b32.xlu0 %v1968_v13, %s3205_s4 }
 0x3a1   :  { %1988 = vrot.lane.b32.xlu1 %v1969_v14, %s3205_s4 }
 0x3a2   :  { %1944 = vrot.lane.b32.xlu0 %v1925_v38, %s3204_s15 }
 0x3a5   :  { %1946 = vrot.lane.b32.xlu1 %v1926_v15, %s3204_s15 }
 0x3a6   :  { %1902 = vrot.lane.b32.xlu0 %v1882_v16, %s3203_s28  ;;  %s3206_s28 = smov [#allocation7]  }
 0x3a7   :  { %s2538_s16 = sshll.u32 %s3206_s28, 4  ;;  %s2539_s16 = int_to_ptr.vmem [resolvable:$true] %s2538_s16 }
 0x3a8   :  { %p3178_p1 = scmp.lt.s32.totalorder %s2539_s16, %s2539_s16 }
 0x3aa   :  { %1990 = vrot.lane.b32.xlu0 %v1970_v19, %s3205_s4 }
 0x3f3   :  { %v1935_v12 = vpop.permute.xlu1 %1934 }
 0x3f4   :  { %v1891_v20 = vpop.permute.xlu0 %1890 }
 0x3f5   :  { %1912 = vst.msk [vmem:[#allocation4] sm:$0xff] %vm1911_vm1, %v1891_v20 }
 0x3f6   :  { %1956 = vst.msk [vmem:[#allocation4] sm:$0xff] %vm1955_vm2, %v1935_v12 }
 0x3f7   :  { %v1893_v18 = vpop.permute.xlu1 %1892 }
 0x3f8   :  { %v1979_v17 = vpop.permute.xlu0 %1978  ;;  %1913 = vst.msk [vmem:[#allocation4 + $0x10] sm:$0xff] %vm1911_vm1, %v1893_v18 }
 0x3f9   :  { %2000 = vst.msk [vmem:[#allocation4] sm:$0xff] %vm1999_vm3, %v1979_v17 }
 0x3fb   :  { %v1981_v23 = vpop.permute.xlu1 %1980 }
 0x3fc   :  { %v1937_v24 = vpop.permute.xlu0 %1936 }
 0x3fd   :  { %1957 = vst.msk [vmem:[#allocation4 + $0x10] sm:$0xff] %vm1955_vm2, %v1937_v24 }
 0x3fe   :  { %2001 = vst.msk [vmem:[#allocation4 + $0x10] sm:$0xff] %vm1999_vm3, %v1981_v23 }
 0x3ff   :  { %v1939_v25 = vpop.permute.xlu1 %1938 }
 0x400   :  { %v1895_v54 = vpop.permute.xlu0 %1894  ;;  %v2022_v26 = vld [vmem:[#allocation4] sm:$0xff] }
 0x401   :  { %1914 = vst.msk [vmem:[#allocation4 + $0x20] sm:$0xff] %vm1911_vm1, %v1895_v54  ;;  %2149 = vmatmul.mubr.f32.vlgmr.msra.gmra.mrb[42].mxu1 %v2022_v26 }
 0x402   :  { %1958 = vst.msk [vmem:[#allocation4 + $0x20] sm:$0xff] %vm1955_vm2, %v1939_v25  ;;  %2601 = vmatprep.mubr.msk.f32.mxu1 %vm1853_vm14, %v2025_v27 }
 0x403   :  { %v1897_v29 = vpop.permute.xlu1 %1896 }
 0x404   :  { %v1983_v30 = vpop.permute.xlu0 %1982  ;;  %1915 = vst.msk [vmem:[#allocation4 + $0x30] sm:$0xff] %vm1911_vm1, %v1897_v29 }
 0x405   :  { %2002 = vst.msk [vmem:[#allocation4 + $0x20] sm:$0xff] %vm1999_vm3, %v1983_v30  ;;  %v2024_v31 = vld [vmem:[#allocation4 + $0x10] sm:$0xff] }
 0x406   :  { %2154 = vmatmul.mubr.f32.gmra.mrb[44].mxu1 %v2024_v31  ;;  %v2618_v31 = vunpack.c.h.bf16 %v2616_v21  ;;  %v2325_v21 = vld [vmem:[%s4757_s7 + $0x48] sm:$0xff] }
 0x407   :  { %2602 = vmatprep.mubr.msk.f32.mxu1 %vm1853_vm14, %v2027_v32  ;;  %v1985_v28 = vpop.permute.xlu1 %1984  ;;  %v2334_v32 = vld [vmem:[%s4757_s7 + $0x90] sm:$0xff] }
 0x408   :  { %v1941_v33 = vpop.permute.xlu0 %1940 }
 0x409   :  { %1959 = vst.msk [vmem:[#allocation4 + $0x30] sm:$0xff] %vm1955_vm2, %v1941_v33  ;;  %v2318_v33 = vld [vmem:[%s4757_s7 + $0x10] sm:$0xff] }
 0x40a   :  { %2003 = vst.msk [vmem:[#allocation4 + $0x30] sm:$0xff] %vm1999_vm3, %v1985_v28  ;;  %v2335_v28 = vld [vmem:[%s4757_s7 + $0x98] sm:$0xff] }
 0x40b   :  { %v1943_v34 = vpop.permute.xlu1 %1942 }
 0x40c   :  { %v1899_v0 = vpop.permute.xlu0 %1898  ;;  %v2026_v35 = vld [vmem:[#allocation4 + $0x20] sm:$0xff] }
 0x40d   :  { %1916 = vst.msk [vmem:[#allocation4 + $0x40] sm:$0xff] %vm1911_vm1, %v1899_v0  ;;  %2159 = vmatmul.mubr.f32.gmra.mrb[46].mxu1 %v2026_v35  ;;  %v2319_v0 = vld [vmem:[%s4757_s7 + $0x18] sm:$0xff]  ;;  %v2337_v35 = vld [vmem:[%s4757_s7 + $0xa8] sm:$0xff] }
 0x40e   :  { %1960 = vst.msk [vmem:[#allocation4 + $0x40] sm:$0xff] %vm1955_vm2, %v1943_v34  ;;  %2603 = vmatprep.mubr.msk.f32.mxu1 %vm1853_vm14, %v2029_v36  ;;  %v3111_v34 = vpack.c.bf16 %v2335_v28, %v2334_v32  ;;  %v3113_v36 = vpack.c.bf16 %v2319_v0, %v2318_v33  ;;  %v2447_v28 = vld [vmem:[%s4759_s9 + $0x50] sm:$0xff]  ;;  %v2448_v33 = vld [vmem:[%s4759_s9 + $0x58] sm:$0xff] }
 0x40f   :  { %v1901_v37 = vpop.permute.xlu1 %1900 }
 0x410   :  { %v1987_v39 = vpop.permute.xlu0 %1986  ;;  %1917 = vst.msk [vmem:[#allocation4 + $0x50] sm:$0xff] %vm1911_vm1, %v1901_v37  ;;  %3112 = vmatprep.subr.bf16.mxu0 %v3111_v34  ;;  %v3155_v34 = vpack.c.bf16 %v2448_v33, %v2447_v28 }
 0x411   :  { %2004 = vst.msk [vmem:[#allocation4 + $0x40] sm:$0xff] %vm1999_vm3, %v1987_v39  ;;  %v2028_v40 = vld [vmem:[#allocation4 + $0x30] sm:$0xff]  ;;  %v2320_v39 = vld [vmem:[%s4757_s7 + $0x20] sm:$0xff]  ;;  %3114 = vmatpush3.bf16.msra.mxu0 %v3113_v36 }
 0x412   :  { %2164 = vmatmul.mubr.f32.gmra.mrb[48].mxu1 %v2028_v40  ;;  %v2321_v40 = vld [vmem:[%s4757_s7 + $0x28] sm:$0xff] }
 0x413   :  { %2604 = vmatprep.mubr.msk.f32.mxu1 %vm1853_vm14, %v2031_v41  ;;  %v1989_v43 = vpop.permute.xlu1 %1988  ;;  %v2338_v41 = vld [vmem:[%s4757_s7 + $0xb0] sm:$0xff] }
 0x414   :  { %v1945_v11 = vpop.permute.xlu0 %1944 }
 0x415   :  { %1961 = vst.msk [vmem:[#allocation4 + $0x50] sm:$0xff] %vm1955_vm2, %v1945_v11  ;;  %v3117_v11 = vpack.c.bf16 %v2321_v40, %v2320_v39  ;;  %v2450_v39 = vld [vmem:[%s4759_s9 + $0x68] sm:$0xff] }
 0x416   :  { %2005 = vst.msk [vmem:[#allocation4 + $0x50] sm:$0xff] %vm1999_vm3, %v1989_v43  ;;  %v2339_v43 = vld [vmem:[%s4757_s7 + $0xb8] sm:$0xff] }
 0x417   :  { %v1947_v44 = vpop.permute.xlu1 %1946 }
 0x418   :  { %v1903_v45 = vpop.permute.xlu0 %1902  ;;  %v2030_v46 = vld [vmem:[#allocation4 + $0x40] sm:$0xff] }
 0x419   :  { %1919 = vst.msk [vmem:[#allocation4 + $0x60] sm:$0xf] %vm1918_vm4, %v1903_v45  ;;  %2169 = vmatmul.mubr.f32.gmra.mrb[50].mxu1 %v2030_v46  ;;  %v2322_v45 = vld [vmem:[%s4757_s7 + $0x30] sm:$0xff]  ;;  %v2323_v46 = vld [vmem:[%s4757_s7 + $0x38] sm:$0xff] }
 0x41a   :  { %2605 = vmatprep.mubr.msk.f32.mxu1 %vm1853_vm14, %v2033_v47  ;;  %1963 = vst.msk [vmem:[#allocation4 + $0x60] sm:$0xf] %vm1962_vm5, %v1947_v44  ;;  %v3119_v44 = vpack.c.bf16 %v2339_v43, %v2338_v41  ;;  %v2340_v47 = vld [vmem:[%s4757_s7 + $0xc0] sm:$0xff]  ;;  %v2451_v41 = vld [vmem:[%s4759_s9 + $0x70] sm:$0xff]  ;;  %v2452_v43 = vld [vmem:[%s4759_s9 + $0x78] sm:$0xff] }
 0x41c   :  { %v1991_v48 = vpop.permute.xlu0 %1990 }
 0x41d   :  { %2007 = vst.msk [vmem:[#allocation4 + $0x60] sm:$0xf] %vm2006_vm6, %v1991_v48  ;;  %v2032_v42 = vld [vmem:[#allocation4 + $0x50] sm:$0xff]  ;;  %v2341_v48 = vld [vmem:[%s4757_s7 + $0xc8] sm:$0xff] }
 0x41e   :  { %2174 = vmatmul.mubr.f32.gmra.mrb[52].mxu1 %v2032_v42  ;;  %v3121_v42 = vpack.c.bf16 %v2323_v46, %v2322_v45  ;;  %v2612_v45 = vld [vmem:[%s4758_s8] ss:$0 sm:$0xff] }
 0x41f   :  { %2606 = vmatprep.mubr.msk.f32.mxu1 %vm1853_vm14, %v2035_v22  ;;  %v3123_v22 = vpack.c.bf16 %v2341_v48, %v2340_v47 }
 0x424   :  { %v2034_v49 = vld [vmem:[#allocation4 + $0x60] sm:$0xf] }
 0x425   :  { %2179 = vmatmul.mubr.f32.gmra.mrb[54].mxu1 %v2034_v49  ;;  %v2324_v49 = vld [vmem:[%s4757_s7 + $0x40] sm:$0xff] }
 0x426   :  { %2981 = vmatprep.mubr.msk.f32.mxu1 %vm2195_vm7, %v2617_v50  ;;  %v2342_v50 = vld [vmem:[%s4757_s7 + $0xd0] sm:$0xff]  ;;  %v3125_v52 = vpack.c.bf16 %v2325_v21, %v2324_v49 }
 0x427   :  { %v3127_v53 = vpack.c.bf16 %v2343_v51, %v2342_v50 }
 0x4d4   :  { %v2150_v61 = vpop.f32.mrb[42].mxu1 }
 0x4d5   :  { %v2152_v59 = vpop.f32.mrb[43].mxu1  ;;  %v2151_v60 = vadd.f32 %v2599_v58, %v2150_v61  ;;  %v2345_v61 = vld [vmem:[%s4757_s7 + $0xe8] sm:$0xff] }
 0x4d6   :  { %v3131_v59 = vpack.c.bf16 %v2345_v61, %v2344_v57 }
 0x4d7   :  { %v2184_v2 = vmax.f32 %v2151_v60, 0.0  ;;  %v2328_v60 = vld [vmem:[%s4757_s7 + $0x60] sm:$0xff] }
 0x4d9   :  { %v2155_v62 = vpop.f32.mrb[44].mxu1 }
 0x4da   :  { %v2156_v63 = vadd.f32 %v2599_v58, %v2155_v62  ;;  %v2157_v1 = vpop.f32.mrb[45].mxu1  ;;  %v2329_v62 = vld [vmem:[%s4757_s7 + $0x68] sm:$0xff] }
 0x4db   :  { %v2347_v1 = vld [vmem:[%s4757_s7 + $0xf8] sm:$0xff] }
 0x4dc   :  { %v2185_v3 = vmax.f32 %v2156_v63, 0.0  ;;  %v2346_v63 = vld [vmem:[%s4757_s7 + $0xf0] sm:$0xff] }
 0x4de   :  { %v3095_v6 = vpack.c.bf16 %v2185_v3, %v2184_v2  ;;  %v3133_v2 = vpack.c.bf16 %v2329_v62, %v2328_v60  ;;  %v3135_v3 = vpack.c.bf16 %v2347_v1, %v2346_v63 }
 0x4e0   :  { %v2160_v7 = vpop.f32.mrb[46].mxu1  ;;  %3096 = vmatprep.subr.bf16.mxu1 %v3095_v6 }
 0x4e1   :  { %v2162_v8 = vpop.f32.mrb[47].mxu1  ;;  %3098 = vmatpush3.bf16.msra.mxu1 %v3095_v6  ;;  %v2161_v9 = vadd.f32 %v2599_v58, %v2160_v7  ;;  %v2330_v6 = vld [vmem:[%s4757_s7 + $0x70] sm:$0xff]  ;;  %v2331_v7 = vld [vmem:[%s4757_s7 + $0x78] sm:$0xff] }
 0x4e2   :  { %v3137_v8 = vpack.c.bf16 %v2331_v7, %v2330_v6 }
 0x4e3   :  { %v2186_v38 = vmax.f32 %v2161_v9, 0.0 }
 0x4e5   :  { %v2165_v10 = vpop.f32.mrb[48].mxu1 }
 0x4e6   :  { %v2166_v13 = vadd.f32 %v2599_v58, %v2165_v10  ;;  %v2167_v14 = vpop.f32.mrb[49].mxu1 }
 0x4e8   :  { %v2187_v15 = vmax.f32 %v2166_v13, 0.0 }
 0x4ea   :  { %v3099_v16 = vpack.c.bf16 %v2187_v15, %v2186_v38 }
 0x4ec   :  { %v2170_v19 = vpop.f32.mrb[50].mxu1  ;;  %3100 = vmatprep.subr.bf16.mxu1 %v3099_v16 }
 0x4ed   :  { %v2172_v12 = vpop.f32.mrb[51].mxu1  ;;  %3102 = vmatpush3.bf16.msra.mxu1 %v3099_v16  ;;  %v2171_v20 = vadd.f32 %v2599_v58, %v2170_v19  ;;  %v2437_v19 = vld [vmem:[%s4759_s9] sm:$0xff] }
 0x4ee   :  { %v2438_v12 = vld [vmem:[%s4759_s9 + $0x8] sm:$0xff] }
 0x4ef   :  { %v2188_v24 = vmax.f32 %v2171_v20, 0.0  ;;  %v2439_v20 = vld [vmem:[%s4759_s9 + $0x10] sm:$0xff] }
 0x4f1   :  { %v2175_v18 = vpop.f32.mrb[52].mxu1 }
 0x4f2   :  { %v2176_v17 = vadd.f32 %v2599_v58, %v2175_v18  ;;  %v2177_v23 = vpop.f32.mrb[53].mxu1  ;;  %v3140_v18 = vpack.c.bf16 %v2438_v12, %v2437_v19 }
 0x4f4   :  { %v2189_v25 = vmax.f32 %v2176_v17, 0.0  ;;  %v2440_v17 = vld [vmem:[%s4759_s9 + $0x18] sm:$0xff] }
 0x4f5   :  { %v3143_v23 = vpack.c.bf16 %v2440_v17, %v2439_v20 }
 0x4f6   :  { %v3103_v54 = vpack.c.bf16 %v2189_v25, %v2188_v24  ;;  %v2441_v24 = vld [vmem:[%s4759_s9 + $0x20] sm:$0xff]  ;;  %v2442_v25 = vld [vmem:[%s4759_s9 + $0x28] sm:$0xff] }
 0x4f8   :  { %v2180_v26 = vpop.f32.mrb[54].mxu1  ;;  %3104 = vmatprep.subr.bf16.mxu1 %v3103_v54 }
 0x4f9   :  { %v2181_v27 = vadd.f32 %v2599_v58, %v2180_v26  ;;  %v2182_v29 = vpop.f32.mrb[55].mxu1  ;;  %3106 = vmatpush3.bf16.msra.mxu1 %v3103_v54  ;;  %v3129_v58 = vpack.c.bf16 %v2327_v56, %v2326_v55  ;;  %v3146_v54 = vpack.c.bf16 %v2442_v25, %v2441_v24  ;;  %v2443_v26 = vld [vmem:[%s4759_s9 + $0x30] sm:$0xff] }
 0x4fb   :  { %v2190_v30 = vmax.f32 %v2181_v27, 0.0  ;;  %v2444_v27 = vld [vmem:[%s4759_s9 + $0x38] sm:$0xff] }
 0x4fc   :  { %v3149_v29 = vpack.c.bf16 %v2444_v27, %v2443_v26 }
 0x4fd   :  { %2979 = vmatprep.subr.msk.mxu1 %vm1572_vm12, %v2190_v30 }
 0x4fe   :  { %2980 = vmatpush3.msk.msra.mxu1 %vm1572_vm12, %v2190_v30  ;;  %v2445_v30 = vld [vmem:[%s4759_s9 + $0x40] sm:$0xff] }
 0x4ff   :  { %2982 = vmatmul.mubr.msk.f32.vlgmr.msra.gmra.mrb[56].mxu1 %vm2195_vm7, %v2618_v31  ;;  %3139 = vmatprep.subr.bf16.mxu1 %v3199_v4  ;;  %v2446_v31 = vld [vmem:[%s4759_s9 + $0x48] sm:$0xff] }
 0x500   :  { %3016 = vmatprep.mubr.msk.f32.mxu1 %vm3200_vm0, %v3201_v5  ;;  %v2336_v5 = vld [vmem:[%s4757_s7 + $0xa0] sm:$0xff]  ;;  %vm2281_vm0 = vcmask 523264   ;;  %3141 = vmatpush3.bf16.msra.mxu1 %v3140_v18  ;;  %v3152_v32 = vpack.c.bf16 %v2446_v31, %v2445_v30 }
 0x501   :  { %v3115_v37 = vpack.c.bf16 %v2337_v35, %v2336_v5  ;;  %3142 = vmatprep.subr.bf16.mxu1 %v3199_v4 }
 0x503   :  { %3116 = vmatprep.subr.bf16.mxu0 %v3115_v37  ;;  %v2449_v37 = vld [vmem:[%s4759_s9 + $0x60] sm:$0xff]  ;;  %s3173_s9 = scalar_lea.vmem %s2539_s16, 32 }
 0x504   :  { %3118 = vmatpush3.bf16.msra.mxu0 %v3117_v11  ;;  %3144 = vmatpush3.bf16.msra.mxu1 %v3143_v23  ;;  %v3158_v40 = vpack.c.bf16 %v2450_v39, %v2449_v37  ;;  %v3161_v11 = vpack.c.bf16 %v2452_v43, %v2451_v41  ;;  %p3174_p0 = scmp.ne.s32.totalorder %s2539_s16, %s3173_s9  ;;  %p3179_p2 = scmp.lt.s32.totalorder %s3173_s9, %s3173_s9 }
 0x505   :  { %3120 = vmatprep.subr.bf16.mxu0 %v3119_v44  ;;  %3145 = vmatprep.subr.bf16.mxu1 %v3199_v4 }
 0x506   :  { %p3180_p3 = por %p3179_p2, %p3178_p1 }
 0x508   :  { %3122 = vmatpush3.bf16.msra.mxu0 %v3121_v42  ;;  %3147 = vmatpush3.bf16.msra.mxu1 %v3146_v54  ;;  %p3181_p4 = pnand %p3180_p3, %p3174_p0 }
 0x509   :  { %3124 = vmatprep.subr.bf16.mxu0 %v3123_v22  ;;  %3148 = vmatprep.subr.bf16.mxu1 %v3199_v4 }
 0x50c   :  { %3126 = vmatpush3.bf16.msra.mxu0 %v3125_v52  ;;  %3150 = vmatpush3.bf16.msra.mxu1 %v3149_v29 }
 0x50d   :  { %3128 = vmatprep.subr.bf16.mxu0 %v3127_v53  ;;  %3151 = vmatprep.subr.bf16.mxu1 %v3199_v4 }
 0x510   :  { %3130 = vmatpush3.bf16.msra.mxu0 %v3129_v58  ;;  %3153 = vmatpush3.bf16.msra.mxu1 %v3152_v32 }
 0x511   :  { %3132 = vmatprep.subr.bf16.mxu0 %v3131_v59  ;;  %3154 = vmatprep.subr.bf16.mxu1 %v3199_v4 }
 0x514   :  { %3134 = vmatpush3.bf16.msra.mxu0 %v3133_v2  ;;  %3156 = vmatpush3.bf16.msra.mxu1 %v3155_v34 }
 0x515   :  { %3136 = vmatprep.subr.bf16.mxu0 %v3135_v3  ;;  %3157 = vmatprep.subr.bf16.mxu1 %v3199_v4 }
 0x518   :  { %3138 = vmatpush3.bf16.msra.mxu0 %v3137_v8  ;;  %3159 = vmatpush3.bf16.msra.mxu1 %v3158_v40 }
 0x519   :  { %3160 = vmatprep.subr.bf16.mxu1 %v3199_v4  ;;  %v2614_v4 = vld [vmem:[%s4760_s10] ss:$0 sm:$0xff] }
 0x51c   :  { %3162 = vmatpush3.bf16.msra.mxu1 %v3161_v11 }
 0x5d2   :  { %v2983_v9 = vpop.f32.mrb[56].mxu1 }
 0x5d3   :  { %v2271_v10 = vpop.f32.mrb[57].mxu1 }
 0x5d4   :  { %v2280_v13 = vmax.f32 %v2271_v10, %v2983_v9 }
 0x5d6   :  { %2282 = vst.msk [vmem:[#allocation5] sm:$0xff] %vm2281_vm0, %v2280_v13 }
 0x5dd   :  { %v2611_v14 = vld.sshfl [vmem:[#allocation5 + $0x6] sm:$0x3 pattern:$0x76325410]  ;;  %v2300_v38 = vld [vmem:[#allocation5 + $0x4] sm:$0x3] }
 0x5de   :  { %2311 = vrot.lane.b32.xlu0 %v2611_v14, %s3204_s15  ;;  %v2610_v15 = vld.sshfl [vmem:[#allocation5 + $0x2] sm:$0x3 pattern:$0x76325410]  ;;  %2301 = vst.msk [vmem:[#allocation6 + $0x2] sm:$0x3] %vm2284_vm8, %v2300_v38 }
 0x5df   :  { %v2283_v16 = vld [vmem:[#allocation5] sm:$0x3]  ;;  %2295 = vrot.lane.b32.xlu1 %v2610_v15, %s3204_s15 }
 0x5e0   :  { %2285 = vst.msk [vmem:[#allocation6] sm:$0x3] %vm2284_vm8, %v2283_v16 }
 0x650   :  { %v2312_v0 = vpop.permute.xlu0 %2311 }
 0x651   :  { %2314 = vst.msk [vmem:[#allocation6 + $0x2] sm:$0x3] %vm2298_vm9, %v2312_v0  ;;  %v2296_v5 = vpop.permute.xlu1 %2295 }
 0x652   :  { %2299 = vst.msk [vmem:[#allocation6] sm:$0x3] %vm2298_vm9, %v2296_v5 }
 0x659   :  { %v2613_v35 = vld.sshfl [vmem:[#allocation6] sm:$0x33 pattern:$0x76325410] }
 0x65a   :  { %v2363_v36 = vcombine.high %v2613_v35, %v2613_v35 }
 0x65c   :  { %2430 = vmatprep.mubr.f32.mxu0 %v2363_v36 }
 0x65d   :  { %2431 = vmatmul.mubr.f32.vlgmr.msra.gmra.mrb[74].mxu0 %v2613_v35 }
 0x730   :  { %v2795_v44 = vpop.f32.mrb[74].mxu0 }
 0x731   :  { %v2796_v46 = vpop.f32.mrb[75].mxu0 }
 0x732   :  { %v2797_v47 = vadd.f32 %v2796_v46, %v2795_v44 }
 0x734   :  { %v2433_v48 = vadd.f32 %v2797_v47, %v2612_v45 }
 0x736   :  { %v2436_v42 = vmax.f32 %v2433_v48, 0.0 }
 0x738   :  { %3017 = vmatmul.mubr.f32.vlgmr.msra.gmra.mrb[58].mxu1 %v2436_v42 }
 0x80b   :  { %v2526_v22 = vpop.f32.mrb[58].mxu1 }
 0x80c   :  { %v2527_v49 = vadd.f32 %v2614_v4, %v2526_v22  ;;  %v3018_v21 = vpop.f32.mrb[59].mxu1 }
 0x80e   :  { %2531 = vst.msk [vmem:[#allocation7] sm:$0x3] %vm2530_vm10, %v2527_v49 }
 0x80f   :  { %3184 = shalt.err (!%p3181_p4)
}
 0x810   :  { %s3185_s21 = scalar_lea.hbm %s4761_s11, 32 }
 0x811   :  { %p3186_p5 = scmp.ne.s32.totalorder %s4761_s11, %s3185_s21  ;;  %p3189_p6 = scmp.lt.u32.totalorder %s3185_s21, %s4761_s11 }
 0x813   :  { %p3191_p7 = pnand %p3189_p6, %p3186_p5 }
 0x815   :  { %3194 = shalt.err (!%p3191_p7)
}
 0x816   :  { %2541 = dma.vmem_to_hbm [thread:$0]  %s2539_s16, 32, %s4761_s11, [#allocation8]  }
 0x817   :  { %3195 = dma.done.wait [#allocation8], 32  }
 0x818   :  { %3196 = vsyncadd [#allocation8], 4294967264 }
 0x819   :  { %2545 = vsyncpa [#allocation8], 1 }

</bundles_post_ra>
